<compile_context>
chip_gen: v6e
topology: v6e:2x2x1
jax: 0.10.0
libtpu: 0.0.40
codegen_flags: <defaults>
</compile_context>

<pallas_src>
import math
import functools

import jax
import jax.numpy as jnp
from jax.experimental import pallas as pl
from jax.experimental.pallas import tpu as pltpu

NUM_HEADS = 8          # copy_config.num_attention_heads = 8 (fixed by the module)
LN_EPS = 1e-5          # RobertaConfig default layer_norm_eps


def _layer_norm(y, gamma, beta, eps=LN_EPS):
    mean = jnp.mean(y, axis=-1, keepdims=True)
    var = jnp.mean((y - mean) ** 2, axis=-1, keepdims=True)
    return (y - mean) * jax.lax.rsqrt(var + eps) * gamma + beta


def _gelu(x):
    # TODO(synk): HF "gelu" is the exact erf-based GELU; this is the tanh
    # approximation (Mosaic-safe elementwise ops), max abs diff ~1e-3.
    c = math.sqrt(2.0 / math.pi)
    return 0.5 * x * (1.0 + jnp.tanh(c * (x + 0.044715 * x * x * x)))


def _roberta_stack_kernel(
    x_ref, am_ref,
    wqkv_ref, bqkv_ref, wo_ref, bo_ref, ln1g_ref, ln1b_ref,
    w1_ref, b1_ref, w2_ref, b2_ref, ln2g_ref, ln2b_ref,
    out_ref,
    h_ref,                      # VMEM scratch: running hidden state (Bt*S, H) f32
    qkv_ref,                    # VMEM scratch: fused QKV (Bt*S, 3H) bf16
    ctx_ref,                    # VMEM scratch: attention context (Bt*S, H) bf16
    *, num_heads):
    l = pl.program_id(1)
    bt = am_ref.shape[0]                     # batch-tile size
    S = am_ref.shape[2]
    M, H = h_ref.shape                       # M = bt * S
    dh = H // num_heads
    f32, bf16 = jnp.float32, jnp.bfloat16

    # Load the external hidden state only for the first layer of this batch tile;
    # afterwards the running hidden state stays resident in VMEM.
    @pl.when(l == 0)
    def _():
        h_ref[...] = x_ref[...].astype(f32)

    x = h_ref[...]                           # (M, H) f32, residual stream

    def matmul_bias(inp, w_ref, b_ref):
        # bf16 MXU matmul, f32 accumulation, f32 bias add.
        return jnp.dot(inp.astype(bf16), w_ref[0],
                       preferred_element_type=f32) + b_ref[0]

    # --- self attention ------------------------------------------------------
    # Fused QKV projection; 1/sqrt(dh) already folded into the Q columns/bias.
    # Stored bf16 so the per-head attention matmuls read pre-cast operands
    # straight from the scratch ref (ref loads, no per-head value relayout).
    qkv_ref[...] = matmul_bias(x, wqkv_ref, bqkv_ref).astype(bf16)

    for b in range(bt):
        r0 = b * S
        # Hoist the additive key-mask broadcast once per batch element.
        am_b = jnp.broadcast_to(am_ref[b].astype(f32), (S, S))
        for h in range(num_heads):
            lo = h * dh
            qh = qkv_ref[r0:r0 + S, 0 * H + lo:0 * H + lo + dh]   # (S, dh) bf16
            kh = qkv_ref[r0:r0 + S, 1 * H + lo:1 * H + lo + dh]   # (S, dh) bf16
            vh = qkv_ref[r0:r0 + S, 2 * H + lo:2 * H + lo + dh]   # (S, dh) bf16
            s = jax.lax.dot_general(qh, kh, (((1,), (1,)), ((), ())),
                                    preferred_element_type=f32)   # (S, S) f32
            s = s + am_b
            s = s - jnp.max(s, axis=-1, keepdims=True)
            p = jnp.exp(s)
            p = p * pl.reciprocal(jnp.sum(p, axis=-1, keepdims=True), approx=True)
            ctx_h = jnp.dot(p.astype(bf16), vh, preferred_element_type=f32)
            ctx_ref[r0:r0 + S, lo:lo + dh] = ctx_h.astype(bf16)

    attn_out = matmul_bias(ctx_ref[...], wo_ref, bo_ref)          # (M, H) f32
    h1 = _layer_norm(attn_out + x, ln1g_ref[0], ln1b_ref[0])

    # --- feed forward --------------------------------------------------------
    inter = _gelu(matmul_bias(h1, w1_ref, b1_ref)).astype(bf16)   # (M, 4H) bf16
    ffn_out = jnp.dot(inter, w2_ref[0], preferred_element_type=f32) + b2_ref[0]
    h2 = _layer_norm(ffn_out + h1, ln2g_ref[0], ln2b_ref[0])

    h_ref[...] = h2                                               # carry to layer l+1

    @pl.when(l == pl.num_programs(1) - 1)
    def _():
        out_ref[...] = h2.astype(out_ref.dtype)


def _vmem_limit_bytes():
    # Per-generation VMEM budget: physical capacity minus ~8 MiB headroom
    # (v7x: 64 MiB -> 56 MiB; v5e/v6e: 128 MiB -> 120 MiB), instead of a flat cap.
    cap = 64 * 1024 * 1024
    try:
        info = pltpu.get_tpu_info()
        cap = int(getattr(info, "vmem_capacity_bytes", cap) or cap)
    except Exception:
        pass
    return max(32 * 1024 * 1024, cap - 8 * 1024 * 1024)


def _pick_batch_tile(B, S, H, I):
    # Fold as many batch elements as possible into one block (amortizes weight
    # DMA, lengthens the MXU M dim) while keeping activation scratch well inside
    # VMEM so double-buffered weights still fit on the 64 MiB (v7x) part.
    act_budget = 24 * 1024 * 1024
    for bt in range(B, 0, -1):
        if B % bt:
            continue
        m = bt * S
        act = (m * H * 4                 # residual scratch (f32)
               + m * 3 * H * 2           # qkv scratch (bf16)
               + m * H * 2               # ctx scratch (bf16)
               + m * I * 4               # FFN intermediate value (f32)
               + NUM_HEADS * S * S * 4   # attention score temporaries
               + 2 * m * H * 4)          # hidden in/out blocks
        if act <= act_budget:
            return bt
    return 1


def roberta_layer_stack(hidden_states, attention_mask, layer_params, batch_tile=None):
    """RobertaLayerStack.forward (return_dict=False, eval mode, no cache/attn
    outputs): sequentially applies each RobertaLayer; returns last_hidden_state.

    hidden_states: (B, S, H) f32; attention_mask: (B, 1, S) additive f32;
    layer_params: list of per-layer dicts (weights in (in, out) layout, f32)."""
    B, S, H = hidden_states.shape
    L = len(layer_params)
    I = layer_params[0]["w1"].shape[1]
    assert H % NUM_HEADS == 0, "hidden_size must be divisible by num_attention_heads"
    dh = H // NUM_HEADS
    scale = 1.0 / math.sqrt(dh)

    bf16, f32 = jnp.bfloat16, jnp.float32
    stack = lambda name, dt: jnp.stack([p[name].astype(dt) for p in layer_params])
    # Fused QKV weight/bias, attention scale folded into the Q columns (host-side,
    # one-time parameter transform).
    wqkv = jnp.stack([jnp.concatenate(
        [p["wq"] * scale, p["wk"], p["wv"]], axis=1).astype(bf16)
        for p in layer_params])                                    # (L, H, 3H) bf16
    bqkv = jnp.stack([jnp.concatenate(
        [p["bq"] * scale, p["bk"], p["bv"]], axis=1).astype(f32)
        for p in layer_params])                                    # (L, 1, 3H) f32
    wo, w1, w2 = stack("wo", bf16), stack("w1", bf16), stack("w2", bf16)
    bo, b1, b2 = stack("bo", f32), stack("b1", f32), stack("b2", f32)
    ln1g, ln1b = stack("ln1_g", f32), stack("ln1_b", f32)
    ln2g, ln2b = stack("ln2_g", f32), stack("ln2_b", f32)

    Bt = batch_tile or _pick_batch_tile(B, S, H, I)
    assert B % Bt == 0
    Mt = Bt * S

    # (B, S, H) -> (B*S, H): free row-major reshape; gives a lane-dense (Mt, H)
    # residual block per grid step with M = Bt*S.
    x_flat = hidden_states.reshape(B * S, H)

    per_layer = lambda shape: pl.BlockSpec(
        shape, lambda b, l: (l,) + (0,) * (len(shape) - 1))

    in_specs = [
        pl.BlockSpec((Mt, H), lambda b, l: (b, 0)),                # hidden (flattened)
        pl.BlockSpec((Bt, 1, S), lambda b, l: (b, 0, 0)),          # additive mask
        per_layer((1, H, 3 * H)), per_layer((1, 1, 3 * H)),        # wqkv, bqkv
        per_layer((1, H, H)), per_layer((1, 1, H)),                # wo, bo
        per_layer((1, 1, H)), per_layer((1, 1, H)),                # ln1 gamma, beta
        per_layer((1, H, I)), per_layer((1, 1, I)),                # w1, b1
        per_layer((1, I, H)), per_layer((1, 1, H)),                # w2, b2
        per_layer((1, 1, H)), per_layer((1, 1, H)),                # ln2 gamma, beta
    ]

    kernel = functools.partial(_roberta_stack_kernel, num_heads=NUM_HEADS)
    out_flat = pl.pallas_call(
        kernel,
        out_shape=jax.ShapeDtypeStruct((B * S, H), jnp.float32),
        grid=(B // Bt, L),                                         # layer axis innermost
        in_specs=in_specs,
        out_specs=pl.BlockSpec((Mt, H), lambda b, l: (b, 0)),
        scratch_shapes=[
            pltpu.VMEM((Mt, H), jnp.float32),                      # residual stream
            pltpu.VMEM((Mt, 3 * H), jnp.bfloat16),                 # fused QKV
            pltpu.VMEM((Mt, H), jnp.bfloat16),                     # attention context
        ],
        compiler_params=pltpu.CompilerParams(
            dimension_semantics=("parallel", "arbitrary"),
            vmem_limit_bytes=_vmem_limit_bytes(),
        ),
    )(
        x_flat, attention_mask,
        wqkv, bqkv, wo, bo, ln1g, ln1b, w1, b1, w2, b2, ln2g, ln2b,
    )
    return out_flat.reshape(B, S, H)


# ------------------------ pure-JAX reference (sanity check) ------------------
def _ref_layer(x, am, p):
    B, S, H = x.shape
    dh = H // NUM_HEADS

    def lin(inp, w, b):
        return inp @ w + b

    q = lin(x, p["wq"], p["bq"]).reshape(B, S, NUM_HEADS, dh).transpose(0, 2, 1, 3)
    k = lin(x, p["wk"], p["bk"]).reshape(B, S, NUM_HEADS, dh).transpose(0, 2, 1, 3)
    v = lin(x, p["wv"], p["bv"]).reshape(B, S, NUM_HEADS, dh).transpose(0, 2, 1, 3)
    scores = jnp.einsum("bhqd,bhkd->bhqk", q, k) / math.sqrt(dh)
    scores = scores + am[:, :, None, :]                    # (B,1,1,S) broadcast
    probs = jax.nn.softmax(scores, axis=-1)
    ctx = jnp.einsum("bhqk,bhkd->bhqd", probs, v).transpose(0, 2, 1, 3).reshape(B, S, H)
    attn_out = lin(ctx, p["wo"], p["bo"])
    h1 = _layer_norm(attn_out + x, p["ln1_g"], p["ln1_b"])
    inter = _gelu(lin(h1, p["w1"], p["b1"]))
    ffn_out = lin(inter, p["w2"], p["b2"])
    return _layer_norm(ffn_out + h1, p["ln2_g"], p["ln2_b"])


def _ref_stack(x, am, layer_params):
    for p in layer_params:
        x = _ref_layer(x, am, p)
    return x


def init_layer_params(key, hidden, intermediate):
    ks = jax.random.split(key, 6)
    n = lambda k, s: (0.02 * jax.random.normal(k, s)).astype(jnp.float32)
    return {
        "wq": n(ks[0], (hidden, hidden)), "bq": jnp.zeros((1, hidden), jnp.float32),
        "wk": n(ks[1], (hidden, hidden)), "bk": jnp.zeros((1, hidden), jnp.float32),
        "wv": n(ks[2], (hidden, hidden)), "bv": jnp.zeros((1, hidden), jnp.float32),
        "wo": n(ks[3], (hidden, hidden)), "bo": jnp.zeros((1, hidden), jnp.float32),
        "ln1_g": jnp.ones((1, hidden), jnp.float32),
        "ln1_b": jnp.zeros((1, hidden), jnp.float32),
        "w1": n(ks[4], (hidden, intermediate)),
        "b1": jnp.zeros((1, intermediate), jnp.float32),
        "w2": n(ks[5], (intermediate, hidden)),
        "b2": jnp.zeros((1, hidden), jnp.float32),
        "ln2_g": jnp.ones((1, hidden), jnp.float32),
        "ln2_b": jnp.zeros((1, hidden), jnp.float32),
    }


if __name__ == "__main__":
    # Small shapes consistent with the module: projection_dim (=hidden) 32,
    # intermediate = 4*32 = 128, 8 attention heads, 2 layers, batch=2, seq=8.
    B, S, H, L = 2, 8, 32, 2
    INTER = 4 * H

    root = jax.random.PRNGKey(0)
    kx, *kls = jax.random.split(root, 1 + L)
    hidden_states = jax.random.normal(kx, (B, S, H), dtype=jnp.float32)

    # HF-style additive attention mask, (B, 1, S): batch 1 masks its last 2 tokens.
    attention_mask = jnp.zeros((B, 1, S), dtype=jnp.float32)
    attention_mask = attention_mask.at[1, 0, S - 2:].set(-1e9)

    layer_params = [init_layer_params(k, H, INTER) for k in kls]

    out = roberta_layer_stack(hidden_states, attention_mask, layer_params)
    out = jax.block_until_ready(out)

    ref = _ref_stack(hidden_states, attention_mask, layer_params)
    assert out.shape == (B, S, H)
    assert jnp.allclose(out, ref, rtol=2e-2, atol=2e-2), "mismatch vs JAX reference"

    print("KERNEL_OK")
</pallas_src>

<mosaic_0001>
module attributes {stable_mosaic.version = 11 : i64} {
  func.func @_roberta_stack_kernel(%arg0: i32, %arg1: i32, %arg2: memref<16x32xf32, #tpu.memory_space<vmem>>, %arg3: memref<2x1x8xf32, #tpu.memory_space<vmem>>, %arg4: memref<1x32x96xbf16, #tpu.memory_space<vmem>>, %arg5: memref<1x1x96xf32, #tpu.memory_space<vmem>>, %arg6: memref<1x32x32xbf16, #tpu.memory_space<vmem>>, %arg7: memref<1x1x32xf32, #tpu.memory_space<vmem>>, %arg8: memref<1x1x32xf32, #tpu.memory_space<vmem>>, %arg9: memref<1x1x32xf32, #tpu.memory_space<vmem>>, %arg10: memref<1x32x128xbf16, #tpu.memory_space<vmem>>, %arg11: memref<1x1x128xf32, #tpu.memory_space<vmem>>, %arg12: memref<1x128x32xbf16, #tpu.memory_space<vmem>>, %arg13: memref<1x1x32xf32, #tpu.memory_space<vmem>>, %arg14: memref<1x1x32xf32, #tpu.memory_space<vmem>>, %arg15: memref<1x1x32xf32, #tpu.memory_space<vmem>>, %arg16: memref<16x32xf32, #tpu.memory_space<vmem>>, %arg17: memref<16x32xf32, #tpu.memory_space<vmem>>, %arg18: memref<16x96xbf16, #tpu.memory_space<vmem>>, %arg19: memref<16x32xbf16, #tpu.memory_space<vmem>>) attributes {dimension_semantics = [#tpu.dimension_semantics<parallel>, #tpu.dimension_semantics<arbitrary>], iteration_bounds = array<i64: 1, 2>, scalar_prefetch = 0 : i64, scratch_operands = 3 : i64, tpu.core_type = #tpu.core_type<tc>, window_params = [{transform_indices = @transform_0, window_bounds = array<i64: 16, 32>}, {transform_indices = @transform_1, window_bounds = array<i64: 2, 1, 8>}, {transform_indices = @transform_2, window_bounds = array<i64: 1, 32, 96>}, {transform_indices = @transform_3, window_bounds = array<i64: 1, 1, 96>}, {transform_indices = @transform_4, window_bounds = array<i64: 1, 32, 32>}, {transform_indices = @transform_5, window_bounds = array<i64: 1, 1, 32>}, {transform_indices = @transform_6, window_bounds = array<i64: 1, 1, 32>}, {transform_indices = @transform_7, window_bounds = array<i64: 1, 1, 32>}, {transform_indices = @transform_8, window_bounds = array<i64: 1, 32, 128>}, {transform_indices = @transform_9, window_bounds = array<i64: 1, 1, 128>}, {transform_indices = @transform_10, window_bounds = array<i64: 1, 128, 32>}, {transform_indices = @transform_11, window_bounds = array<i64: 1, 1, 32>}, {transform_indices = @transform_12, window_bounds = array<i64: 1, 1, 32>}, {transform_indices = @transform_13, window_bounds = array<i64: 1, 1, 32>}, {transform_indices = @transform_14, window_bounds = array<i64: 16, 32>}]} {
    %c0_i32 = arith.constant 0 : i32
    %0 = arith.cmpi eq, %arg1, %c0_i32 : i32
    %1 = arith.extui %0 : i1 to i32
    %c0_i32_0 = arith.constant 0 : i32
    %2 = arith.cmpi ne, %1, %c0_i32_0 : i32
    scf.if %2 {
      %c0_236 = arith.constant 0 : index
      %c0_237 = arith.constant 0 : index
      %421 = vector.load %arg2[%c0_236, %c0_237] : memref<16x32xf32, #tpu.memory_space<vmem>>, vector<16x32xf32>
      %c0_238 = arith.constant 0 : index
      %c0_239 = arith.constant 0 : index
      %422 = vector.load %arg17[%c0_238, %c0_239] : memref<16x32xf32, #tpu.memory_space<vmem>>, vector<16x32xf32>
      tpu.vector_store %arg17[%c0_238, %c0_239], %421 {strides = array<i32>} : memref<16x32xf32, #tpu.memory_space<vmem>>, vector<16x32xf32>,
    } else {
    }
    %c0 = arith.constant 0 : index
    %c0_1 = arith.constant 0 : index
    %3 = vector.load %arg17[%c0, %c0_1] : memref<16x32xf32, #tpu.memory_space<vmem>>, vector<16x32xf32>
    %4 = arith.truncf %3 : vector<16x32xf32> to vector<16x32xbf16>
    %c0_2 = arith.constant 0 : index
    %c0_3 = arith.constant 0 : index
    %c0_4 = arith.constant 0 : index
    %5 = vector.load %arg4[%c0_2, %c0_3, %c0_4] : memref<1x32x96xbf16, #tpu.memory_space<vmem>>, vector<1x32x96xbf16>
    %6 = vector.shape_cast %5 : vector<1x32x96xbf16> to vector<32x96xbf16>
    %cst = arith.constant dense<0.000000e+00> : vector<16x96xf32>
    %7 = tpu.matmul %4, %6, %cst {dimension_numbers = #tpu.dot_dimension_numbers<[1], [0], [0], [1], [0, 0, 1, 1], [], []>} : vector<16x32xbf16>, vector<32x96xbf16>, vector<16x96xf32> -> vector<16x96xf32>
    %c0_5 = arith.constant 0 : index
    %c0_6 = arith.constant 0 : index
    %c0_7 = arith.constant 0 : index
    %8 = vector.load %arg5[%c0_5, %c0_6, %c0_7] : memref<1x1x96xf32, #tpu.memory_space<vmem>>, vector<1x1x96xf32>
    %9 = vector.shape_cast %8 : vector<1x1x96xf32> to vector<1x96xf32>
    %10 = vector.broadcast %9 : vector<1x96xf32> to vector<16x96xf32>
    %11 = arith.addf %7, %10 : vector<16x96xf32>
    %12 = arith.truncf %11 : vector<16x96xf32> to vector<16x96xbf16>
    %c0_8 = arith.constant 0 : index
    %c0_9 = arith.constant 0 : index
    %13 = vector.load %arg18[%c0_8, %c0_9] : memref<16x96xbf16, #tpu.memory_space<vmem>>, vector<16x96xbf16>
    tpu.vector_store %arg18[%c0_8, %c0_9], %12 {strides = array<i32>} : memref<16x96xbf16, #tpu.memory_space<vmem>>, vector<16x96xbf16>,
    %c0_10 = arith.constant 0 : index
    %c0_11 = arith.constant 0 : index
    %c0_12 = arith.constant 0 : index
    %14 = vector.load %arg3[%c0_10, %c0_11, %c0_12] : memref<2x1x8xf32, #tpu.memory_space<vmem>>, vector<1x1x8xf32>
    %15 = vector.shape_cast %14 : vector<1x1x8xf32> to vector<1x8xf32>
    %16 = vector.shape_cast %15 : vector<1x8xf32> to vector<1x8xf32>
    %17 = vector.broadcast %16 : vector<1x8xf32> to vector<8x8xf32>
    %c0_13 = arith.constant 0 : index
    %c0_14 = arith.constant 0 : index
    %18 = vector.load %arg18[%c0_13, %c0_14] : memref<16x96xbf16, #tpu.memory_space<vmem>>, vector<8x4xbf16>
    %c0_15 = arith.constant 0 : index
    %c32 = arith.constant 32 : index
    %19 = vector.load %arg18[%c0_15, %c32] : memref<16x96xbf16, #tpu.memory_space<vmem>>, vector<8x4xbf16>
    %c0_16 = arith.constant 0 : index
    %c64 = arith.constant 64 : index
    %20 = vector.load %arg18[%c0_16, %c64] : memref<16x96xbf16, #tpu.memory_space<vmem>>, vector<8x4xbf16>
    %cst_17 = arith.constant dense<0.000000e+00> : vector<8x8xf32>
    %21 = tpu.matmul %18, %19, %cst_17 {dimension_numbers = #tpu.dot_dimension_numbers<[1], [1], [0], [0], [0, 0, 1, 0], [], []>} : vector<8x4xbf16>, vector<8x4xbf16>, vector<8x8xf32> -> vector<8x8xf32>
    %22 = arith.addf %21, %17 : vector<8x8xf32>
    %cst_18 = arith.constant dense<0xFF800000> : vector<8xf32>
    %23 = vector.multi_reduction <maximumf>, %22, %cst_18 [1] : vector<8x8xf32> to vector<8xf32>
    %24 = vector.shape_cast %23 : vector<8xf32> to vector<8x1xf32>
    %25 = vector.broadcast %24 : vector<8x1xf32> to vector<8x8xf32>
    %26 = arith.subf %22, %25 : vector<8x8xf32>
    %27 = math.exp %26 : vector<8x8xf32>
    %cst_19 = arith.constant dense<0.000000e+00> : vector<8xf32>
    %28 = vector.multi_reduction <add>, %27, %cst_19 [1] : vector<8x8xf32> to vector<8xf32>
    %29 = vector.shape_cast %28 : vector<8xf32> to vector<8x1xf32>
    %30 = tpu.reciprocal %29 {approx = true} : vector<8x1xf32> -> vector<8x1xf32>
    %31 = vector.broadcast %30 : vector<8x1xf32> to vector<8x8xf32>
    %32 = arith.mulf %27, %31 : vector<8x8xf32>
    %33 = arith.truncf %32 : vector<8x8xf32> to vector<8x8xbf16>
    %cst_20 = arith.constant dense<0.000000e+00> : vector<8x4xf32>
    %34 = tpu.matmul %33, %20, %cst_20 {dimension_numbers = #tpu.dot_dimension_numbers<[1], [0], [0], [1], [0, 0, 1, 1], [], []>} : vector<8x8xbf16>, vector<8x4xbf16>, vector<8x4xf32> -> vector<8x4xf32>
    %35 = arith.truncf %34 : vector<8x4xf32> to vector<8x4xbf16>
    %c0_21 = arith.constant 0 : index
    %c0_22 = arith.constant 0 : index
    %36 = vector.load %arg19[%c0_21, %c0_22] : memref<16x32xbf16, #tpu.memory_space<vmem>>, vector<8x4xbf16>
    tpu.vector_store %arg19[%c0_21, %c0_22], %35 {strides = array<i32>} : memref<16x32xbf16, #tpu.memory_space<vmem>>, vector<8x4xbf16>,
    %c0_23 = arith.constant 0 : index
    %c4 = arith.constant 4 : index
    %37 = vector.load %arg18[%c0_23, %c4] : memref<16x96xbf16, #tpu.memory_space<vmem>>, vector<8x4xbf16>
    %c0_24 = arith.constant 0 : index
    %c36 = arith.constant 36 : index
    %38 = vector.load %arg18[%c0_24, %c36] : memref<16x96xbf16, #tpu.memory_space<vmem>>, vector<8x4xbf16>
    %c0_25 = arith.constant 0 : index
    %c68 = arith.constant 68 : index
    %39 = vector.load %arg18[%c0_25, %c68] : memref<16x96xbf16, #tpu.memory_space<vmem>>, vector<8x4xbf16>
    %cst_26 = arith.constant dense<0.000000e+00> : vector<8x8xf32>
    %40 = tpu.matmul %37, %38, %cst_26 {dimension_numbers = #tpu.dot_dimension_numbers<[1], [1], [0], [0], [0, 0, 1, 0], [], []>} : vector<8x4xbf16>, vector<8x4xbf16>, vector<8x8xf32> -> vector<8x8xf32>
    %41 = arith.addf %40, %17 : vector<8x8xf32>
    %cst_27 = arith.constant dense<0xFF800000> : vector<8xf32>
    %42 = vector.multi_reduction <maximumf>, %41, %cst_27 [1] : vector<8x8xf32> to vector<8xf32>
    %43 = vector.shape_cast %42 : vector<8xf32> to vector<8x1xf32>
    %44 = vector.broadcast %43 : vector<8x1xf32> to vector<8x8xf32>
    %45 = arith.subf %41, %44 : vector<8x8xf32>
    %46 = math.exp %45 : vector<8x8xf32>
    %cst_28 = arith.constant dense<0.000000e+00> : vector<8xf32>
    %47 = vector.multi_reduction <add>, %46, %cst_28 [1] : vector<8x8xf32> to vector<8xf32>
    %48 = vector.shape_cast %47 : vector<8xf32> to vector<8x1xf32>
    %49 = tpu.reciprocal %48 {approx = true} : vector<8x1xf32> -> vector<8x1xf32>
    %50 = vector.broadcast %49 : vector<8x1xf32> to vector<8x8xf32>
    %51 = arith.mulf %46, %50 : vector<8x8xf32>
    %52 = arith.truncf %51 : vector<8x8xf32> to vector<8x8xbf16>
    %cst_29 = arith.constant dense<0.000000e+00> : vector<8x4xf32>
    %53 = tpu.matmul %52, %39, %cst_29 {dimension_numbers = #tpu.dot_dimension_numbers<[1], [0], [0], [1], [0, 0, 1, 1], [], []>} : vector<8x8xbf16>, vector<8x4xbf16>, vector<8x4xf32> -> vector<8x4xf32>
    %54 = arith.truncf %53 : vector<8x4xf32> to vector<8x4xbf16>
    %c0_30 = arith.constant 0 : index
    %c4_31 = arith.constant 4 : index
    %55 = vector.load %arg19[%c0_30, %c4_31] : memref<16x32xbf16, #tpu.memory_space<vmem>>, vector<8x4xbf16>
    tpu.vector_store %arg19[%c0_30, %c4_31], %54 {strides = array<i32>} : memref<16x32xbf16, #tpu.memory_space<vmem>>, vector<8x4xbf16>,
    %c0_32 = arith.constant 0 : index
    %c8 = arith.constant 8 : index
    %56 = vector.load %arg18[%c0_32, %c8] : memref<16x96xbf16, #tpu.memory_space<vmem>>, vector<8x4xbf16>
    %c0_33 = arith.constant 0 : index
    %c40 = arith.constant 40 : index
    %57 = vector.load %arg18[%c0_33, %c40] : memref<16x96xbf16, #tpu.memory_space<vmem>>, vector<8x4xbf16>
    %c0_34 = arith.constant 0 : index
    %c72 = arith.constant 72 : index
    %58 = vector.load %arg18[%c0_34, %c72] : memref<16x96xbf16, #tpu.memory_space<vmem>>, vector<8x4xbf16>
    %cst_35 = arith.constant dense<0.000000e+00> : vector<8x8xf32>
    %59 = tpu.matmul %56, %57, %cst_35 {dimension_numbers = #tpu.dot_dimension_numbers<[1], [1], [0], [0], [0, 0, 1, 0], [], []>} : vector<8x4xbf16>, vector<8x4xbf16>, vector<8x8xf32> -> vector<8x8xf32>
    %60 = arith.addf %59, %17 : vector<8x8xf32>
    %cst_36 = arith.constant dense<0xFF800000> : vector<8xf32>
    %61 = vector.multi_reduction <maximumf>, %60, %cst_36 [1] : vector<8x8xf32> to vector<8xf32>
    %62 = vector.shape_cast %61 : vector<8xf32> to vector<8x1xf32>
    %63 = vector.broadcast %62 : vector<8x1xf32> to vector<8x8xf32>
    %64 = arith.subf %60, %63 : vector<8x8xf32>
    %65 = math.exp %64 : vector<8x8xf32>
    %cst_37 = arith.constant dense<0.000000e+00> : vector<8xf32>
    %66 = vector.multi_reduction <add>, %65, %cst_37 [1] : vector<8x8xf32> to vector<8xf32>
    %67 = vector.shape_cast %66 : vector<8xf32> to vector<8x1xf32>
    %68 = tpu.reciprocal %67 {approx = true} : vector<8x1xf32> -> vector<8x1xf32>
    %69 = vector.broadcast %68 : vector<8x1xf32> to vector<8x8xf32>
    %70 = arith.mulf %65, %69 : vector<8x8xf32>
    %71 = arith.truncf %70 : vector<8x8xf32> to vector<8x8xbf16>
    %cst_38 = arith.constant dense<0.000000e+00> : vector<8x4xf32>
    %72 = tpu.matmul %71, %58, %cst_38 {dimension_numbers = #tpu.dot_dimension_numbers<[1], [0], [0], [1], [0, 0, 1, 1], [], []>} : vector<8x8xbf16>, vector<8x4xbf16>, vector<8x4xf32> -> vector<8x4xf32>
    %73 = arith.truncf %72 : vector<8x4xf32> to vector<8x4xbf16>
    %c0_39 = arith.constant 0 : index
    %c8_40 = arith.constant 8 : index
    %74 = vector.load %arg19[%c0_39, %c8_40] : memref<16x32xbf16, #tpu.memory_space<vmem>>, vector<8x4xbf16>
    tpu.vector_store %arg19[%c0_39, %c8_40], %73 {strides = array<i32>} : memref<16x32xbf16, #tpu.memory_space<vmem>>, vector<8x4xbf16>,
    %c0_41 = arith.constant 0 : index
    %c12 = arith.constant 12 : index
    %75 = vector.load %arg18[%c0_41, %c12] : memref<16x96xbf16, #tpu.memory_space<vmem>>, vector<8x4xbf16>
    %c0_42 = arith.constant 0 : index
    %c44 = arith.constant 44 : index
    %76 = vector.load %arg18[%c0_42, %c44] : memref<16x96xbf16, #tpu.memory_space<vmem>>, vector<8x4xbf16>
    %c0_43 = arith.constant 0 : index
    %c76 = arith.constant 76 : index
    %77 = vector.load %arg18[%c0_43, %c76] : memref<16x96xbf16, #tpu.memory_space<vmem>>, vector<8x4xbf16>
    %cst_44 = arith.constant dense<0.000000e+00> : vector<8x8xf32>
    %78 = tpu.matmul %75, %76, %cst_44 {dimension_numbers = #tpu.dot_dimension_numbers<[1], [1], [0], [0], [0, 0, 1, 0], [], []>} : vector<8x4xbf16>, vector<8x4xbf16>, vector<8x8xf32> -> vector<8x8xf32>
    %79 = arith.addf %78, %17 : vector<8x8xf32>
    %cst_45 = arith.constant dense<0xFF800000> : vector<8xf32>
    %80 = vector.multi_reduction <maximumf>, %79, %cst_45 [1] : vector<8x8xf32> to vector<8xf32>
    %81 = vector.shape_cast %80 : vector<8xf32> to vector<8x1xf32>
    %82 = vector.broadcast %81 : vector<8x1xf32> to vector<8x8xf32>
    %83 = arith.subf %79, %82 : vector<8x8xf32>
    %84 = math.exp %83 : vector<8x8xf32>
    %cst_46 = arith.constant dense<0.000000e+00> : vector<8xf32>
    %85 = vector.multi_reduction <add>, %84, %cst_46 [1] : vector<8x8xf32> to vector<8xf32>
    %86 = vector.shape_cast %85 : vector<8xf32> to vector<8x1xf32>
    %87 = tpu.reciprocal %86 {approx = true} : vector<8x1xf32> -> vector<8x1xf32>
    %88 = vector.broadcast %87 : vector<8x1xf32> to vector<8x8xf32>
    %89 = arith.mulf %84, %88 : vector<8x8xf32>
    %90 = arith.truncf %89 : vector<8x8xf32> to vector<8x8xbf16>
    %cst_47 = arith.constant dense<0.000000e+00> : vector<8x4xf32>
    %91 = tpu.matmul %90, %77, %cst_47 {dimension_numbers = #tpu.dot_dimension_numbers<[1], [0], [0], [1], [0, 0, 1, 1], [], []>} : vector<8x8xbf16>, vector<8x4xbf16>, vector<8x4xf32> -> vector<8x4xf32>
    %92 = arith.truncf %91 : vector<8x4xf32> to vector<8x4xbf16>
    %c0_48 = arith.constant 0 : index
    %c12_49 = arith.constant 12 : index
    %93 = vector.load %arg19[%c0_48, %c12_49] : memref<16x32xbf16, #tpu.memory_space<vmem>>, vector<8x4xbf16>
    tpu.vector_store %arg19[%c0_48, %c12_49], %92 {strides = array<i32>} : memref<16x32xbf16, #tpu.memory_space<vmem>>, vector<8x4xbf16>,
    %c0_50 = arith.constant 0 : index
    %c16 = arith.constant 16 : index
    %94 = vector.load %arg18[%c0_50, %c16] : memref<16x96xbf16, #tpu.memory_space<vmem>>, vector<8x4xbf16>
    %c0_51 = arith.constant 0 : index
    %c48 = arith.constant 48 : index
    %95 = vector.load %arg18[%c0_51, %c48] : memref<16x96xbf16, #tpu.memory_space<vmem>>, vector<8x4xbf16>
    %c0_52 = arith.constant 0 : index
    %c80 = arith.constant 80 : index
    %96 = vector.load %arg18[%c0_52, %c80] : memref<16x96xbf16, #tpu.memory_space<vmem>>, vector<8x4xbf16>
    %cst_53 = arith.constant dense<0.000000e+00> : vector<8x8xf32>
    %97 = tpu.matmul %94, %95, %cst_53 {dimension_numbers = #tpu.dot_dimension_numbers<[1], [1], [0], [0], [0, 0, 1, 0], [], []>} : vector<8x4xbf16>, vector<8x4xbf16>, vector<8x8xf32> -> vector<8x8xf32>
    %98 = arith.addf %97, %17 : vector<8x8xf32>
    %cst_54 = arith.constant dense<0xFF800000> : vector<8xf32>
    %99 = vector.multi_reduction <maximumf>, %98, %cst_54 [1] : vector<8x8xf32> to vector<8xf32>
    %100 = vector.shape_cast %99 : vector<8xf32> to vector<8x1xf32>
    %101 = vector.broadcast %100 : vector<8x1xf32> to vector<8x8xf32>
    %102 = arith.subf %98, %101 : vector<8x8xf32>
    %103 = math.exp %102 : vector<8x8xf32>
    %cst_55 = arith.constant dense<0.000000e+00> : vector<8xf32>
    %104 = vector.multi_reduction <add>, %103, %cst_55 [1] : vector<8x8xf32> to vector<8xf32>
    %105 = vector.shape_cast %104 : vector<8xf32> to vector<8x1xf32>
    %106 = tpu.reciprocal %105 {approx = true} : vector<8x1xf32> -> vector<8x1xf32>
    %107 = vector.broadcast %106 : vector<8x1xf32> to vector<8x8xf32>
    %108 = arith.mulf %103, %107 : vector<8x8xf32>
    %109 = arith.truncf %108 : vector<8x8xf32> to vector<8x8xbf16>
    %cst_56 = arith.constant dense<0.000000e+00> : vector<8x4xf32>
    %110 = tpu.matmul %109, %96, %cst_56 {dimension_numbers = #tpu.dot_dimension_numbers<[1], [0], [0], [1], [0, 0, 1, 1], [], []>} : vector<8x8xbf16>, vector<8x4xbf16>, vector<8x4xf32> -> vector<8x4xf32>
    %111 = arith.truncf %110 : vector<8x4xf32> to vector<8x4xbf16>
    %c0_57 = arith.constant 0 : index
    %c16_58 = arith.constant 16 : index
    %112 = vector.load %arg19[%c0_57, %c16_58] : memref<16x32xbf16, #tpu.memory_space<vmem>>, vector<8x4xbf16>
    tpu.vector_store %arg19[%c0_57, %c16_58], %111 {strides = array<i32>} : memref<16x32xbf16, #tpu.memory_space<vmem>>, vector<8x4xbf16>,
    %c0_59 = arith.constant 0 : index
    %c20 = arith.constant 20 : index
    %113 = vector.load %arg18[%c0_59, %c20] : memref<16x96xbf16, #tpu.memory_space<vmem>>, vector<8x4xbf16>
    %c0_60 = arith.constant 0 : index
    %c52 = arith.constant 52 : index
    %114 = vector.load %arg18[%c0_60, %c52] : memref<16x96xbf16, #tpu.memory_space<vmem>>, vector<8x4xbf16>
    %c0_61 = arith.constant 0 : index
    %c84 = arith.constant 84 : index
    %115 = vector.load %arg18[%c0_61, %c84] : memref<16x96xbf16, #tpu.memory_space<vmem>>, vector<8x4xbf16>
    %cst_62 = arith.constant dense<0.000000e+00> : vector<8x8xf32>
    %116 = tpu.matmul %113, %114, %cst_62 {dimension_numbers = #tpu.dot_dimension_numbers<[1], [1], [0], [0], [0, 0, 1, 0], [], []>} : vector<8x4xbf16>, vector<8x4xbf16>, vector<8x8xf32> -> vector<8x8xf32>
    %117 = arith.addf %116, %17 : vector<8x8xf32>
    %cst_63 = arith.constant dense<0xFF800000> : vector<8xf32>
    %118 = vector.multi_reduction <maximumf>, %117, %cst_63 [1] : vector<8x8xf32> to vector<8xf32>
    %119 = vector.shape_cast %118 : vector<8xf32> to vector<8x1xf32>
    %120 = vector.broadcast %119 : vector<8x1xf32> to vector<8x8xf32>
    %121 = arith.subf %117, %120 : vector<8x8xf32>
    %122 = math.exp %121 : vector<8x8xf32>
    %cst_64 = arith.constant dense<0.000000e+00> : vector<8xf32>
    %123 = vector.multi_reduction <add>, %122, %cst_64 [1] : vector<8x8xf32> to vector<8xf32>
    %124 = vector.shape_cast %123 : vector<8xf32> to vector<8x1xf32>
    %125 = tpu.reciprocal %124 {approx = true} : vector<8x1xf32> -> vector<8x1xf32>
    %126 = vector.broadcast %125 : vector<8x1xf32> to vector<8x8xf32>
    %127 = arith.mulf %122, %126 : vector<8x8xf32>
    %128 = arith.truncf %127 : vector<8x8xf32> to vector<8x8xbf16>
    %cst_65 = arith.constant dense<0.000000e+00> : vector<8x4xf32>
    %129 = tpu.matmul %128, %115, %cst_65 {dimension_numbers = #tpu.dot_dimension_numbers<[1], [0], [0], [1], [0, 0, 1, 1], [], []>} : vector<8x8xbf16>, vector<8x4xbf16>, vector<8x4xf32> -> vector<8x4xf32>
    %130 = arith.truncf %129 : vector<8x4xf32> to vector<8x4xbf16>
    %c0_66 = arith.constant 0 : index
    %c20_67 = arith.constant 20 : index
    %131 = vector.load %arg19[%c0_66, %c20_67] : memref<16x32xbf16, #tpu.memory_space<vmem>>, vector<8x4xbf16>
    tpu.vector_store %arg19[%c0_66, %c20_67], %130 {strides = array<i32>} : memref<16x32xbf16, #tpu.memory_space<vmem>>, vector<8x4xbf16>,
    %c0_68 = arith.constant 0 : index
    %c24 = arith.constant 24 : index
    %132 = vector.load %arg18[%c0_68, %c24] : memref<16x96xbf16, #tpu.memory_space<vmem>>, vector<8x4xbf16>
    %c0_69 = arith.constant 0 : index
    %c56 = arith.constant 56 : index
    %133 = vector.load %arg18[%c0_69, %c56] : memref<16x96xbf16, #tpu.memory_space<vmem>>, vector<8x4xbf16>
    %c0_70 = arith.constant 0 : index
    %c88 = arith.constant 88 : index
    %134 = vector.load %arg18[%c0_70, %c88] : memref<16x96xbf16, #tpu.memory_space<vmem>>, vector<8x4xbf16>
    %cst_71 = arith.constant dense<0.000000e+00> : vector<8x8xf32>
    %135 = tpu.matmul %132, %133, %cst_71 {dimension_numbers = #tpu.dot_dimension_numbers<[1], [1], [0], [0], [0, 0, 1, 0], [], []>} : vector<8x4xbf16>, vector<8x4xbf16>, vector<8x8xf32> -> vector<8x8xf32>
    %136 = arith.addf %135, %17 : vector<8x8xf32>
    %cst_72 = arith.constant dense<0xFF800000> : vector<8xf32>
    %137 = vector.multi_reduction <maximumf>, %136, %cst_72 [1] : vector<8x8xf32> to vector<8xf32>
    %138 = vector.shape_cast %137 : vector<8xf32> to vector<8x1xf32>
    %139 = vector.broadcast %138 : vector<8x1xf32> to vector<8x8xf32>
    %140 = arith.subf %136, %139 : vector<8x8xf32>
    %141 = math.exp %140 : vector<8x8xf32>
    %cst_73 = arith.constant dense<0.000000e+00> : vector<8xf32>
    %142 = vector.multi_reduction <add>, %141, %cst_73 [1] : vector<8x8xf32> to vector<8xf32>
    %143 = vector.shape_cast %142 : vector<8xf32> to vector<8x1xf32>
    %144 = tpu.reciprocal %143 {approx = true} : vector<8x1xf32> -> vector<8x1xf32>
    %145 = vector.broadcast %144 : vector<8x1xf32> to vector<8x8xf32>
    %146 = arith.mulf %141, %145 : vector<8x8xf32>
    %147 = arith.truncf %146 : vector<8x8xf32> to vector<8x8xbf16>
    %cst_74 = arith.constant dense<0.000000e+00> : vector<8x4xf32>
    %148 = tpu.matmul %147, %134, %cst_74 {dimension_numbers = #tpu.dot_dimension_numbers<[1], [0], [0], [1], [0, 0, 1, 1], [], []>} : vector<8x8xbf16>, vector<8x4xbf16>, vector<8x4xf32> -> vector<8x4xf32>
    %149 = arith.truncf %148 : vector<8x4xf32> to vector<8x4xbf16>
    %c0_75 = arith.constant 0 : index
    %c24_76 = arith.constant 24 : index
    %150 = vector.load %arg19[%c0_75, %c24_76] : memref<16x32xbf16, #tpu.memory_space<vmem>>, vector<8x4xbf16>
    tpu.vector_store %arg19[%c0_75, %c24_76], %149 {strides = array<i32>} : memref<16x32xbf16, #tpu.memory_space<vmem>>, vector<8x4xbf16>,
    %c0_77 = arith.constant 0 : index
    %c28 = arith.constant 28 : index
    %151 = vector.load %arg18[%c0_77, %c28] : memref<16x96xbf16, #tpu.memory_space<vmem>>, vector<8x4xbf16>
    %c0_78 = arith.constant 0 : index
    %c60 = arith.constant 60 : index
    %152 = vector.load %arg18[%c0_78, %c60] : memref<16x96xbf16, #tpu.memory_space<vmem>>, vector<8x4xbf16>
    %c0_79 = arith.constant 0 : index
    %c92 = arith.constant 92 : index
    %153 = vector.load %arg18[%c0_79, %c92] : memref<16x96xbf16, #tpu.memory_space<vmem>>, vector<8x4xbf16>
    %cst_80 = arith.constant dense<0.000000e+00> : vector<8x8xf32>
    %154 = tpu.matmul %151, %152, %cst_80 {dimension_numbers = #tpu.dot_dimension_numbers<[1], [1], [0], [0], [0, 0, 1, 0], [], []>} : vector<8x4xbf16>, vector<8x4xbf16>, vector<8x8xf32> -> vector<8x8xf32>
    %155 = arith.addf %154, %17 : vector<8x8xf32>
    %cst_81 = arith.constant dense<0xFF800000> : vector<8xf32>
    %156 = vector.multi_reduction <maximumf>, %155, %cst_81 [1] : vector<8x8xf32> to vector<8xf32>
    %157 = vector.shape_cast %156 : vector<8xf32> to vector<8x1xf32>
    %158 = vector.broadcast %157 : vector<8x1xf32> to vector<8x8xf32>
    %159 = arith.subf %155, %158 : vector<8x8xf32>
    %160 = math.exp %159 : vector<8x8xf32>
    %cst_82 = arith.constant dense<0.000000e+00> : vector<8xf32>
    %161 = vector.multi_reduction <add>, %160, %cst_82 [1] : vector<8x8xf32> to vector<8xf32>
    %162 = vector.shape_cast %161 : vector<8xf32> to vector<8x1xf32>
    %163 = tpu.reciprocal %162 {approx = true} : vector<8x1xf32> -> vector<8x1xf32>
    %164 = vector.broadcast %163 : vector<8x1xf32> to vector<8x8xf32>
    %165 = arith.mulf %160, %164 : vector<8x8xf32>
    %166 = arith.truncf %165 : vector<8x8xf32> to vector<8x8xbf16>
    %cst_83 = arith.constant dense<0.000000e+00> : vector<8x4xf32>
    %167 = tpu.matmul %166, %153, %cst_83 {dimension_numbers = #tpu.dot_dimension_numbers<[1], [0], [0], [1], [0, 0, 1, 1], [], []>} : vector<8x8xbf16>, vector<8x4xbf16>, vector<8x4xf32> -> vector<8x4xf32>
    %168 = arith.truncf %167 : vector<8x4xf32> to vector<8x4xbf16>
    %c0_84 = arith.constant 0 : index
    %c28_85 = arith.constant 28 : index
    %169 = vector.load %arg19[%c0_84, %c28_85] : memref<16x32xbf16, #tpu.memory_space<vmem>>, vector<8x4xbf16>
    tpu.vector_store %arg19[%c0_84, %c28_85], %168 {strides = array<i32>} : memref<16x32xbf16, #tpu.memory_space<vmem>>, vector<8x4xbf16>,
    %c1 = arith.constant 1 : index
    %c0_86 = arith.constant 0 : index
    %c0_87 = arith.constant 0 : index
    %170 = vector.load %arg3[%c1, %c0_86, %c0_87] : memref<2x1x8xf32, #tpu.memory_space<vmem>>, vector<1x1x8xf32>
    %171 = vector.shape_cast %170 : vector<1x1x8xf32> to vector<1x8xf32>
    %172 = vector.shape_cast %171 : vector<1x8xf32> to vector<1x8xf32>
    %173 = vector.broadcast %172 : vector<1x8xf32> to vector<8x8xf32>
    %c8_88 = arith.constant 8 : index
    %c0_89 = arith.constant 0 : index
    %174 = vector.load %arg18[%c8_88, %c0_89] : memref<16x96xbf16, #tpu.memory_space<vmem>>, vector<8x4xbf16>
    %c8_90 = arith.constant 8 : index
    %c32_91 = arith.constant 32 : index
    %175 = vector.load %arg18[%c8_90, %c32_91] : memref<16x96xbf16, #tpu.memory_space<vmem>>, vector<8x4xbf16>
    %c8_92 = arith.constant 8 : index
    %c64_93 = arith.constant 64 : index
    %176 = vector.load %arg18[%c8_92, %c64_93] : memref<16x96xbf16, #tpu.memory_space<vmem>>, vector<8x4xbf16>
    %cst_94 = arith.constant dense<0.000000e+00> : vector<8x8xf32>
    %177 = tpu.matmul %174, %175, %cst_94 {dimension_numbers = #tpu.dot_dimension_numbers<[1], [1], [0], [0], [0, 0, 1, 0], [], []>} : vector<8x4xbf16>, vector<8x4xbf16>, vector<8x8xf32> -> vector<8x8xf32>
    %178 = arith.addf %177, %173 : vector<8x8xf32>
    %cst_95 = arith.constant dense<0xFF800000> : vector<8xf32>
    %179 = vector.multi_reduction <maximumf>, %178, %cst_95 [1] : vector<8x8xf32> to vector<8xf32>
    %180 = vector.shape_cast %179 : vector<8xf32> to vector<8x1xf32>
    %181 = vector.broadcast %180 : vector<8x1xf32> to vector<8x8xf32>
    %182 = arith.subf %178, %181 : vector<8x8xf32>
    %183 = math.exp %182 : vector<8x8xf32>
    %cst_96 = arith.constant dense<0.000000e+00> : vector<8xf32>
    %184 = vector.multi_reduction <add>, %183, %cst_96 [1] : vector<8x8xf32> to vector<8xf32>
    %185 = vector.shape_cast %184 : vector<8xf32> to vector<8x1xf32>
    %186 = tpu.reciprocal %185 {approx = true} : vector<8x1xf32> -> vector<8x1xf32>
    %187 = vector.broadcast %186 : vector<8x1xf32> to vector<8x8xf32>
    %188 = arith.mulf %183, %187 : vector<8x8xf32>
    %189 = arith.truncf %188 : vector<8x8xf32> to vector<8x8xbf16>
    %cst_97 = arith.constant dense<0.000000e+00> : vector<8x4xf32>
    %190 = tpu.matmul %189, %176, %cst_97 {dimension_numbers = #tpu.dot_dimension_numbers<[1], [0], [0], [1], [0, 0, 1, 1], [], []>} : vector<8x8xbf16>, vector<8x4xbf16>, vector<8x4xf32> -> vector<8x4xf32>
    %191 = arith.truncf %190 : vector<8x4xf32> to vector<8x4xbf16>
    %c8_98 = arith.constant 8 : index
    %c0_99 = arith.constant 0 : index
    %192 = vector.load %arg19[%c8_98, %c0_99] : memref<16x32xbf16, #tpu.memory_space<vmem>>, vector<8x4xbf16>
    tpu.vector_store %arg19[%c8_98, %c0_99], %191 {strides = array<i32>} : memref<16x32xbf16, #tpu.memory_space<vmem>>, vector<8x4xbf16>,
    %c8_100 = arith.constant 8 : index
    %c4_101 = arith.constant 4 : index
    %193 = vector.load %arg18[%c8_100, %c4_101] : memref<16x96xbf16, #tpu.memory_space<vmem>>, vector<8x4xbf16>
    %c8_102 = arith.constant 8 : index
    %c36_103 = arith.constant 36 : index
    %194 = vector.load %arg18[%c8_102, %c36_103] : memref<16x96xbf16, #tpu.memory_space<vmem>>, vector<8x4xbf16>
    %c8_104 = arith.constant 8 : index
    %c68_105 = arith.constant 68 : index
    %195 = vector.load %arg18[%c8_104, %c68_105] : memref<16x96xbf16, #tpu.memory_space<vmem>>, vector<8x4xbf16>
    %cst_106 = arith.constant dense<0.000000e+00> : vector<8x8xf32>
    %196 = tpu.matmul %193, %194, %cst_106 {dimension_numbers = #tpu.dot_dimension_numbers<[1], [1], [0], [0], [0, 0, 1, 0], [], []>} : vector<8x4xbf16>, vector<8x4xbf16>, vector<8x8xf32> -> vector<8x8xf32>
    %197 = arith.addf %196, %173 : vector<8x8xf32>
    %cst_107 = arith.constant dense<0xFF800000> : vector<8xf32>
    %198 = vector.multi_reduction <maximumf>, %197, %cst_107 [1] : vector<8x8xf32> to vector<8xf32>
    %199 = vector.shape_cast %198 : vector<8xf32> to vector<8x1xf32>
    %200 = vector.broadcast %199 : vector<8x1xf32> to vector<8x8xf32>
    %201 = arith.subf %197, %200 : vector<8x8xf32>
    %202 = math.exp %201 : vector<8x8xf32>
    %cst_108 = arith.constant dense<0.000000e+00> : vector<8xf32>
    %203 = vector.multi_reduction <add>, %202, %cst_108 [1] : vector<8x8xf32> to vector<8xf32>
    %204 = vector.shape_cast %203 : vector<8xf32> to vector<8x1xf32>
    %205 = tpu.reciprocal %204 {approx = true} : vector<8x1xf32> -> vector<8x1xf32>
    %206 = vector.broadcast %205 : vector<8x1xf32> to vector<8x8xf32>
    %207 = arith.mulf %202, %206 : vector<8x8xf32>
    %208 = arith.truncf %207 : vector<8x8xf32> to vector<8x8xbf16>
    %cst_109 = arith.constant dense<0.000000e+00> : vector<8x4xf32>
    %209 = tpu.matmul %208, %195, %cst_109 {dimension_numbers = #tpu.dot_dimension_numbers<[1], [0], [0], [1], [0, 0, 1, 1], [], []>} : vector<8x8xbf16>, vector<8x4xbf16>, vector<8x4xf32> -> vector<8x4xf32>
    %210 = arith.truncf %209 : vector<8x4xf32> to vector<8x4xbf16>
    %c8_110 = arith.constant 8 : index
    %c4_111 = arith.constant 4 : index
    %211 = vector.load %arg19[%c8_110, %c4_111] : memref<16x32xbf16, #tpu.memory_space<vmem>>, vector<8x4xbf16>
    tpu.vector_store %arg19[%c8_110, %c4_111], %210 {strides = array<i32>} : memref<16x32xbf16, #tpu.memory_space<vmem>>, vector<8x4xbf16>,
    %c8_112 = arith.constant 8 : index
    %c8_113 = arith.constant 8 : index
    %212 = vector.load %arg18[%c8_112, %c8_113] : memref<16x96xbf16, #tpu.memory_space<vmem>>, vector<8x4xbf16>
    %c8_114 = arith.constant 8 : index
    %c40_115 = arith.constant 40 : index
    %213 = vector.load %arg18[%c8_114, %c40_115] : memref<16x96xbf16, #tpu.memory_space<vmem>>, vector<8x4xbf16>
    %c8_116 = arith.constant 8 : index
    %c72_117 = arith.constant 72 : index
    %214 = vector.load %arg18[%c8_116, %c72_117] : memref<16x96xbf16, #tpu.memory_space<vmem>>, vector<8x4xbf16>
    %cst_118 = arith.constant dense<0.000000e+00> : vector<8x8xf32>
    %215 = tpu.matmul %212, %213, %cst_118 {dimension_numbers = #tpu.dot_dimension_numbers<[1], [1], [0], [0], [0, 0, 1, 0], [], []>} : vector<8x4xbf16>, vector<8x4xbf16>, vector<8x8xf32> -> vector<8x8xf32>
    %216 = arith.addf %215, %173 : vector<8x8xf32>
    %cst_119 = arith.constant dense<0xFF800000> : vector<8xf32>
    %217 = vector.multi_reduction <maximumf>, %216, %cst_119 [1] : vector<8x8xf32> to vector<8xf32>
    %218 = vector.shape_cast %217 : vector<8xf32> to vector<8x1xf32>
    %219 = vector.broadcast %218 : vector<8x1xf32> to vector<8x8xf32>
    %220 = arith.subf %216, %219 : vector<8x8xf32>
    %221 = math.exp %220 : vector<8x8xf32>
    %cst_120 = arith.constant dense<0.000000e+00> : vector<8xf32>
    %222 = vector.multi_reduction <add>, %221, %cst_120 [1] : vector<8x8xf32> to vector<8xf32>
    %223 = vector.shape_cast %222 : vector<8xf32> to vector<8x1xf32>
    %224 = tpu.reciprocal %223 {approx = true} : vector<8x1xf32> -> vector<8x1xf32>
    %225 = vector.broadcast %224 : vector<8x1xf32> to vector<8x8xf32>
    %226 = arith.mulf %221, %225 : vector<8x8xf32>
    %227 = arith.truncf %226 : vector<8x8xf32> to vector<8x8xbf16>
    %cst_121 = arith.constant dense<0.000000e+00> : vector<8x4xf32>
    %228 = tpu.matmul %227, %214, %cst_121 {dimension_numbers = #tpu.dot_dimension_numbers<[1], [0], [0], [1], [0, 0, 1, 1], [], []>} : vector<8x8xbf16>, vector<8x4xbf16>, vector<8x4xf32> -> vector<8x4xf32>
    %229 = arith.truncf %228 : vector<8x4xf32> to vector<8x4xbf16>
    %c8_122 = arith.constant 8 : index
    %c8_123 = arith.constant 8 : index
    %230 = vector.load %arg19[%c8_122, %c8_123] : memref<16x32xbf16, #tpu.memory_space<vmem>>, vector<8x4xbf16>
    tpu.vector_store %arg19[%c8_122, %c8_123], %229 {strides = array<i32>} : memref<16x32xbf16, #tpu.memory_space<vmem>>, vector<8x4xbf16>,
    %c8_124 = arith.constant 8 : index
    %c12_125 = arith.constant 12 : index
    %231 = vector.load %arg18[%c8_124, %c12_125] : memref<16x96xbf16, #tpu.memory_space<vmem>>, vector<8x4xbf16>
    %c8_126 = arith.constant 8 : index
    %c44_127 = arith.constant 44 : index
    %232 = vector.load %arg18[%c8_126, %c44_127] : memref<16x96xbf16, #tpu.memory_space<vmem>>, vector<8x4xbf16>
    %c8_128 = arith.constant 8 : index
    %c76_129 = arith.constant 76 : index
    %233 = vector.load %arg18[%c8_128, %c76_129] : memref<16x96xbf16, #tpu.memory_space<vmem>>, vector<8x4xbf16>
    %cst_130 = arith.constant dense<0.000000e+00> : vector<8x8xf32>
    %234 = tpu.matmul %231, %232, %cst_130 {dimension_numbers = #tpu.dot_dimension_numbers<[1], [1], [0], [0], [0, 0, 1, 0], [], []>} : vector<8x4xbf16>, vector<8x4xbf16>, vector<8x8xf32> -> vector<8x8xf32>
    %235 = arith.addf %234, %173 : vector<8x8xf32>
    %cst_131 = arith.constant dense<0xFF800000> : vector<8xf32>
    %236 = vector.multi_reduction <maximumf>, %235, %cst_131 [1] : vector<8x8xf32> to vector<8xf32>
    %237 = vector.shape_cast %236 : vector<8xf32> to vector<8x1xf32>
    %238 = vector.broadcast %237 : vector<8x1xf32> to vector<8x8xf32>
    %239 = arith.subf %235, %238 : vector<8x8xf32>
    %240 = math.exp %239 : vector<8x8xf32>
    %cst_132 = arith.constant dense<0.000000e+00> : vector<8xf32>
    %241 = vector.multi_reduction <add>, %240, %cst_132 [1] : vector<8x8xf32> to vector<8xf32>
    %242 = vector.shape_cast %241 : vector<8xf32> to vector<8x1xf32>
    %243 = tpu.reciprocal %242 {approx = true} : vector<8x1xf32> -> vector<8x1xf32>
    %244 = vector.broadcast %243 : vector<8x1xf32> to vector<8x8xf32>
    %245 = arith.mulf %240, %244 : vector<8x8xf32>
    %246 = arith.truncf %245 : vector<8x8xf32> to vector<8x8xbf16>
    %cst_133 = arith.constant dense<0.000000e+00> : vector<8x4xf32>
    %247 = tpu.matmul %246, %233, %cst_133 {dimension_numbers = #tpu.dot_dimension_numbers<[1], [0], [0], [1], [0, 0, 1, 1], [], []>} : vector<8x8xbf16>, vector<8x4xbf16>, vector<8x4xf32> -> vector<8x4xf32>
    %248 = arith.truncf %247 : vector<8x4xf32> to vector<8x4xbf16>
    %c8_134 = arith.constant 8 : index
    %c12_135 = arith.constant 12 : index
    %249 = vector.load %arg19[%c8_134, %c12_135] : memref<16x32xbf16, #tpu.memory_space<vmem>>, vector<8x4xbf16>
    tpu.vector_store %arg19[%c8_134, %c12_135], %248 {strides = array<i32>} : memref<16x32xbf16, #tpu.memory_space<vmem>>, vector<8x4xbf16>,
    %c8_136 = arith.constant 8 : index
    %c16_137 = arith.constant 16 : index
    %250 = vector.load %arg18[%c8_136, %c16_137] : memref<16x96xbf16, #tpu.memory_space<vmem>>, vector<8x4xbf16>
    %c8_138 = arith.constant 8 : index
    %c48_139 = arith.constant 48 : index
    %251 = vector.load %arg18[%c8_138, %c48_139] : memref<16x96xbf16, #tpu.memory_space<vmem>>, vector<8x4xbf16>
    %c8_140 = arith.constant 8 : index
    %c80_141 = arith.constant 80 : index
    %252 = vector.load %arg18[%c8_140, %c80_141] : memref<16x96xbf16, #tpu.memory_space<vmem>>, vector<8x4xbf16>
    %cst_142 = arith.constant dense<0.000000e+00> : vector<8x8xf32>
    %253 = tpu.matmul %250, %251, %cst_142 {dimension_numbers = #tpu.dot_dimension_numbers<[1], [1], [0], [0], [0, 0, 1, 0], [], []>} : vector<8x4xbf16>, vector<8x4xbf16>, vector<8x8xf32> -> vector<8x8xf32>
    %254 = arith.addf %253, %173 : vector<8x8xf32>
    %cst_143 = arith.constant dense<0xFF800000> : vector<8xf32>
    %255 = vector.multi_reduction <maximumf>, %254, %cst_143 [1] : vector<8x8xf32> to vector<8xf32>
    %256 = vector.shape_cast %255 : vector<8xf32> to vector<8x1xf32>
    %257 = vector.broadcast %256 : vector<8x1xf32> to vector<8x8xf32>
    %258 = arith.subf %254, %257 : vector<8x8xf32>
    %259 = math.exp %258 : vector<8x8xf32>
    %cst_144 = arith.constant dense<0.000000e+00> : vector<8xf32>
    %260 = vector.multi_reduction <add>, %259, %cst_144 [1] : vector<8x8xf32> to vector<8xf32>
    %261 = vector.shape_cast %260 : vector<8xf32> to vector<8x1xf32>
    %262 = tpu.reciprocal %261 {approx = true} : vector<8x1xf32> -> vector<8x1xf32>
    %263 = vector.broadcast %262 : vector<8x1xf32> to vector<8x8xf32>
    %264 = arith.mulf %259, %263 : vector<8x8xf32>
    %265 = arith.truncf %264 : vector<8x8xf32> to vector<8x8xbf16>
    %cst_145 = arith.constant dense<0.000000e+00> : vector<8x4xf32>
    %266 = tpu.matmul %265, %252, %cst_145 {dimension_numbers = #tpu.dot_dimension_numbers<[1], [0], [0], [1], [0, 0, 1, 1], [], []>} : vector<8x8xbf16>, vector<8x4xbf16>, vector<8x4xf32> -> vector<8x4xf32>
    %267 = arith.truncf %266 : vector<8x4xf32> to vector<8x4xbf16>
    %c8_146 = arith.constant 8 : index
    %c16_147 = arith.constant 16 : index
    %268 = vector.load %arg19[%c8_146, %c16_147] : memref<16x32xbf16, #tpu.memory_space<vmem>>, vector<8x4xbf16>
    tpu.vector_store %arg19[%c8_146, %c16_147], %267 {strides = array<i32>} : memref<16x32xbf16, #tpu.memory_space<vmem>>, vector<8x4xbf16>,
    %c8_148 = arith.constant 8 : index
    %c20_149 = arith.constant 20 : index
    %269 = vector.load %arg18[%c8_148, %c20_149] : memref<16x96xbf16, #tpu.memory_space<vmem>>, vector<8x4xbf16>
    %c8_150 = arith.constant 8 : index
    %c52_151 = arith.constant 52 : index
    %270 = vector.load %arg18[%c8_150, %c52_151] : memref<16x96xbf16, #tpu.memory_space<vmem>>, vector<8x4xbf16>
    %c8_152 = arith.constant 8 : index
    %c84_153 = arith.constant 84 : index
    %271 = vector.load %arg18[%c8_152, %c84_153] : memref<16x96xbf16, #tpu.memory_space<vmem>>, vector<8x4xbf16>
    %cst_154 = arith.constant dense<0.000000e+00> : vector<8x8xf32>
    %272 = tpu.matmul %269, %270, %cst_154 {dimension_numbers = #tpu.dot_dimension_numbers<[1], [1], [0], [0], [0, 0, 1, 0], [], []>} : vector<8x4xbf16>, vector<8x4xbf16>, vector<8x8xf32> -> vector<8x8xf32>
    %273 = arith.addf %272, %173 : vector<8x8xf32>
    %cst_155 = arith.constant dense<0xFF800000> : vector<8xf32>
    %274 = vector.multi_reduction <maximumf>, %273, %cst_155 [1] : vector<8x8xf32> to vector<8xf32>
    %275 = vector.shape_cast %274 : vector<8xf32> to vector<8x1xf32>
    %276 = vector.broadcast %275 : vector<8x1xf32> to vector<8x8xf32>
    %277 = arith.subf %273, %276 : vector<8x8xf32>
    %278 = math.exp %277 : vector<8x8xf32>
    %cst_156 = arith.constant dense<0.000000e+00> : vector<8xf32>
    %279 = vector.multi_reduction <add>, %278, %cst_156 [1] : vector<8x8xf32> to vector<8xf32>
    %280 = vector.shape_cast %279 : vector<8xf32> to vector<8x1xf32>
    %281 = tpu.reciprocal %280 {approx = true} : vector<8x1xf32> -> vector<8x1xf32>
    %282 = vector.broadcast %281 : vector<8x1xf32> to vector<8x8xf32>
    %283 = arith.mulf %278, %282 : vector<8x8xf32>
    %284 = arith.truncf %283 : vector<8x8xf32> to vector<8x8xbf16>
    %cst_157 = arith.constant dense<0.000000e+00> : vector<8x4xf32>
    %285 = tpu.matmul %284, %271, %cst_157 {dimension_numbers = #tpu.dot_dimension_numbers<[1], [0], [0], [1], [0, 0, 1, 1], [], []>} : vector<8x8xbf16>, vector<8x4xbf16>, vector<8x4xf32> -> vector<8x4xf32>
    %286 = arith.truncf %285 : vector<8x4xf32> to vector<8x4xbf16>
    %c8_158 = arith.constant 8 : index
    %c20_159 = arith.constant 20 : index
    %287 = vector.load %arg19[%c8_158, %c20_159] : memref<16x32xbf16, #tpu.memory_space<vmem>>, vector<8x4xbf16>
    tpu.vector_store %arg19[%c8_158, %c20_159], %286 {strides = array<i32>} : memref<16x32xbf16, #tpu.memory_space<vmem>>, vector<8x4xbf16>,
    %c8_160 = arith.constant 8 : index
    %c24_161 = arith.constant 24 : index
    %288 = vector.load %arg18[%c8_160, %c24_161] : memref<16x96xbf16, #tpu.memory_space<vmem>>, vector<8x4xbf16>
    %c8_162 = arith.constant 8 : index
    %c56_163 = arith.constant 56 : index
    %289 = vector.load %arg18[%c8_162, %c56_163] : memref<16x96xbf16, #tpu.memory_space<vmem>>, vector<8x4xbf16>
    %c8_164 = arith.constant 8 : index
    %c88_165 = arith.constant 88 : index
    %290 = vector.load %arg18[%c8_164, %c88_165] : memref<16x96xbf16, #tpu.memory_space<vmem>>, vector<8x4xbf16>
    %cst_166 = arith.constant dense<0.000000e+00> : vector<8x8xf32>
    %291 = tpu.matmul %288, %289, %cst_166 {dimension_numbers = #tpu.dot_dimension_numbers<[1], [1], [0], [0], [0, 0, 1, 0], [], []>} : vector<8x4xbf16>, vector<8x4xbf16>, vector<8x8xf32> -> vector<8x8xf32>
    %292 = arith.addf %291, %173 : vector<8x8xf32>
    %cst_167 = arith.constant dense<0xFF800000> : vector<8xf32>
    %293 = vector.multi_reduction <maximumf>, %292, %cst_167 [1] : vector<8x8xf32> to vector<8xf32>
    %294 = vector.shape_cast %293 : vector<8xf32> to vector<8x1xf32>
    %295 = vector.broadcast %294 : vector<8x1xf32> to vector<8x8xf32>
    %296 = arith.subf %292, %295 : vector<8x8xf32>
    %297 = math.exp %296 : vector<8x8xf32>
    %cst_168 = arith.constant dense<0.000000e+00> : vector<8xf32>
    %298 = vector.multi_reduction <add>, %297, %cst_168 [1] : vector<8x8xf32> to vector<8xf32>
    %299 = vector.shape_cast %298 : vector<8xf32> to vector<8x1xf32>
    %300 = tpu.reciprocal %299 {approx = true} : vector<8x1xf32> -> vector<8x1xf32>
    %301 = vector.broadcast %300 : vector<8x1xf32> to vector<8x8xf32>
    %302 = arith.mulf %297, %301 : vector<8x8xf32>
    %303 = arith.truncf %302 : vector<8x8xf32> to vector<8x8xbf16>
    %cst_169 = arith.constant dense<0.000000e+00> : vector<8x4xf32>
    %304 = tpu.matmul %303, %290, %cst_169 {dimension_numbers = #tpu.dot_dimension_numbers<[1], [0], [0], [1], [0, 0, 1, 1], [], []>} : vector<8x8xbf16>, vector<8x4xbf16>, vector<8x4xf32> -> vector<8x4xf32>
    %305 = arith.truncf %304 : vector<8x4xf32> to vector<8x4xbf16>
    %c8_170 = arith.constant 8 : index
    %c24_171 = arith.constant 24 : index
    %306 = vector.load %arg19[%c8_170, %c24_171] : memref<16x32xbf16, #tpu.memory_space<vmem>>, vector<8x4xbf16>
    tpu.vector_store %arg19[%c8_170, %c24_171], %305 {strides = array<i32>} : memref<16x32xbf16, #tpu.memory_space<vmem>>, vector<8x4xbf16>,
    %c8_172 = arith.constant 8 : index
    %c28_173 = arith.constant 28 : index
    %307 = vector.load %arg18[%c8_172, %c28_173] : memref<16x96xbf16, #tpu.memory_space<vmem>>, vector<8x4xbf16>
    %c8_174 = arith.constant 8 : index
    %c60_175 = arith.constant 60 : index
    %308 = vector.load %arg18[%c8_174, %c60_175] : memref<16x96xbf16, #tpu.memory_space<vmem>>, vector<8x4xbf16>
    %c8_176 = arith.constant 8 : index
    %c92_177 = arith.constant 92 : index
    %309 = vector.load %arg18[%c8_176, %c92_177] : memref<16x96xbf16, #tpu.memory_space<vmem>>, vector<8x4xbf16>
    %cst_178 = arith.constant dense<0.000000e+00> : vector<8x8xf32>
    %310 = tpu.matmul %307, %308, %cst_178 {dimension_numbers = #tpu.dot_dimension_numbers<[1], [1], [0], [0], [0, 0, 1, 0], [], []>} : vector<8x4xbf16>, vector<8x4xbf16>, vector<8x8xf32> -> vector<8x8xf32>
    %311 = arith.addf %310, %173 : vector<8x8xf32>
    %cst_179 = arith.constant dense<0xFF800000> : vector<8xf32>
    %312 = vector.multi_reduction <maximumf>, %311, %cst_179 [1] : vector<8x8xf32> to vector<8xf32>
    %313 = vector.shape_cast %312 : vector<8xf32> to vector<8x1xf32>
    %314 = vector.broadcast %313 : vector<8x1xf32> to vector<8x8xf32>
    %315 = arith.subf %311, %314 : vector<8x8xf32>
    %316 = math.exp %315 : vector<8x8xf32>
    %cst_180 = arith.constant dense<0.000000e+00> : vector<8xf32>
    %317 = vector.multi_reduction <add>, %316, %cst_180 [1] : vector<8x8xf32> to vector<8xf32>
    %318 = vector.shape_cast %317 : vector<8xf32> to vector<8x1xf32>
    %319 = tpu.reciprocal %318 {approx = true} : vector<8x1xf32> -> vector<8x1xf32>
    %320 = vector.broadcast %319 : vector<8x1xf32> to vector<8x8xf32>
    %321 = arith.mulf %316, %320 : vector<8x8xf32>
    %322 = arith.truncf %321 : vector<8x8xf32> to vector<8x8xbf16>
    %cst_181 = arith.constant dense<0.000000e+00> : vector<8x4xf32>
    %323 = tpu.matmul %322, %309, %cst_181 {dimension_numbers = #tpu.dot_dimension_numbers<[1], [0], [0], [1], [0, 0, 1, 1], [], []>} : vector<8x8xbf16>, vector<8x4xbf16>, vector<8x4xf32> -> vector<8x4xf32>
    %324 = arith.truncf %323 : vector<8x4xf32> to vector<8x4xbf16>
    %c8_182 = arith.constant 8 : index
    %c28_183 = arith.constant 28 : index
    %325 = vector.load %arg19[%c8_182, %c28_183] : memref<16x32xbf16, #tpu.memory_space<vmem>>, vector<8x4xbf16>
    tpu.vector_store %arg19[%c8_182, %c28_183], %324 {strides = array<i32>} : memref<16x32xbf16, #tpu.memory_space<vmem>>, vector<8x4xbf16>,
    %c0_184 = arith.constant 0 : index
    %c0_185 = arith.constant 0 : index
    %326 = vector.load %arg19[%c0_184, %c0_185] : memref<16x32xbf16, #tpu.memory_space<vmem>>, vector<16x32xbf16>
    %c0_186 = arith.constant 0 : index
    %c0_187 = arith.constant 0 : index
    %c0_188 = arith.constant 0 : index
    %327 = vector.load %arg6[%c0_186, %c0_187, %c0_188] : memref<1x32x32xbf16, #tpu.memory_space<vmem>>, vector<1x32x32xbf16>
    %328 = vector.shape_cast %327 : vector<1x32x32xbf16> to vector<32x32xbf16>
    %cst_189 = arith.constant dense<0.000000e+00> : vector<16x32xf32>
    %329 = tpu.matmul %326, %328, %cst_189 {dimension_numbers = #tpu.dot_dimension_numbers<[1], [0], [0], [1], [0, 0, 1, 1], [], []>} : vector<16x32xbf16>, vector<32x32xbf16>, vector<16x32xf32> -> vector<16x32xf32>
    %c0_190 = arith.constant 0 : index
    %c0_191 = arith.constant 0 : index
    %c0_192 = arith.constant 0 : index
    %330 = vector.load %arg7[%c0_190, %c0_191, %c0_192] : memref<1x1x32xf32, #tpu.memory_space<vmem>>, vector<1x1x32xf32>
    %331 = vector.shape_cast %330 : vector<1x1x32xf32> to vector<1x32xf32>
    %332 = vector.broadcast %331 : vector<1x32xf32> to vector<16x32xf32>
    %333 = arith.addf %329, %332 : vector<16x32xf32>
    %334 = arith.addf %333, %3 : vector<16x32xf32>
    %c0_193 = arith.constant 0 : index
    %c0_194 = arith.constant 0 : index
    %c0_195 = arith.constant 0 : index
    %335 = vector.load %arg8[%c0_193, %c0_194, %c0_195] : memref<1x1x32xf32, #tpu.memory_space<vmem>>, vector<1x1x32xf32>
    %336 = vector.shape_cast %335 : vector<1x1x32xf32> to vector<1x32xf32>
    %c0_196 = arith.constant 0 : index
    %c0_197 = arith.constant 0 : index
    %c0_198 = arith.constant 0 : index
    %337 = vector.load %arg9[%c0_196, %c0_197, %c0_198] : memref<1x1x32xf32, #tpu.memory_space<vmem>>, vector<1x1x32xf32>
    %338 = vector.shape_cast %337 : vector<1x1x32xf32> to vector<1x32xf32>
    %cst_199 = arith.constant dense<0.000000e+00> : vector<16xf32>
    %339 = vector.multi_reduction <add>, %334, %cst_199 [1] : vector<16x32xf32> to vector<16xf32>
    %340 = vector.shape_cast %339 : vector<16xf32> to vector<16x1xf32>
    %cst_200 = arith.constant 3.200000e+01 : f32
    %341 = vector.broadcast %cst_200 : f32 to vector<16x1xf32>
    %342 = arith.divf %340, %341 : vector<16x1xf32>
    %343 = vector.broadcast %342 : vector<16x1xf32> to vector<16x32xf32>
    %344 = arith.subf %334, %343 : vector<16x32xf32>
    %345 = arith.mulf %344, %344 : vector<16x32xf32>
    %cst_201 = arith.constant dense<0.000000e+00> : vector<16xf32>
    %346 = vector.multi_reduction <add>, %345, %cst_201 [1] : vector<16x32xf32> to vector<16xf32>
    %347 = vector.shape_cast %346 : vector<16xf32> to vector<16x1xf32>
    %cst_202 = arith.constant 3.200000e+01 : f32
    %348 = vector.broadcast %cst_202 : f32 to vector<16x1xf32>
    %349 = arith.divf %347, %348 : vector<16x1xf32>
    %350 = vector.broadcast %342 : vector<16x1xf32> to vector<16x32xf32>
    %351 = arith.subf %334, %350 : vector<16x32xf32>
    %cst_203 = arith.constant 9.99999974E-6 : f32
    %352 = vector.broadcast %cst_203 : f32 to vector<16x1xf32>
    %353 = arith.addf %349, %352 : vector<16x1xf32>
    %354 = math.rsqrt %353 : vector<16x1xf32>
    %355 = vector.broadcast %354 : vector<16x1xf32> to vector<16x32xf32>
    %356 = arith.mulf %351, %355 : vector<16x32xf32>
    %357 = vector.broadcast %336 : vector<1x32xf32> to vector<16x32xf32>
    %358 = arith.mulf %356, %357 : vector<16x32xf32>
    %359 = vector.broadcast %338 : vector<1x32xf32> to vector<16x32xf32>
    %360 = arith.addf %358, %359 : vector<16x32xf32>
    %361 = arith.truncf %360 : vector<16x32xf32> to vector<16x32xbf16>
    %c0_204 = arith.constant 0 : index
    %c0_205 = arith.constant 0 : index
    %c0_206 = arith.constant 0 : index
    %362 = vector.load %arg10[%c0_204, %c0_205, %c0_206] : memref<1x32x128xbf16, #tpu.memory_space<vmem>>, vector<1x32x128xbf16>
    %363 = vector.shape_cast %362 : vector<1x32x128xbf16> to vector<32x128xbf16>
    %cst_207 = arith.constant dense<0.000000e+00> : vector<16x128xf32>
    %364 = tpu.matmul %361, %363, %cst_207 {dimension_numbers = #tpu.dot_dimension_numbers<[1], [0], [0], [1], [0, 0, 1, 1], [], []>} : vector<16x32xbf16>, vector<32x128xbf16>, vector<16x128xf32> -> vector<16x128xf32>
    %c0_208 = arith.constant 0 : index
    %c0_209 = arith.constant 0 : index
    %c0_210 = arith.constant 0 : index
    %365 = vector.load %arg11[%c0_208, %c0_209, %c0_210] : memref<1x1x128xf32, #tpu.memory_space<vmem>>, vector<1x1x128xf32>
    %366 = vector.shape_cast %365 : vector<1x1x128xf32> to vector<1x128xf32>
    %367 = vector.broadcast %366 : vector<1x128xf32> to vector<16x128xf32>
    %368 = arith.addf %364, %367 : vector<16x128xf32>
    %cst_211 = arith.constant 5.000000e-01 : f32
    %369 = vector.broadcast %cst_211 : f32 to vector<16x128xf32>
    %370 = arith.mulf %369, %368 : vector<16x128xf32>
    %cst_212 = arith.constant 4.471500e-02 : f32
    %371 = vector.broadcast %cst_212 : f32 to vector<16x128xf32>
    %372 = arith.mulf %371, %368 : vector<16x128xf32>
    %373 = arith.mulf %372, %368 : vector<16x128xf32>
    %374 = arith.mulf %373, %368 : vector<16x128xf32>
    %375 = arith.addf %368, %374 : vector<16x128xf32>
    %cst_213 = arith.constant 0.797884583 : f32
    %376 = vector.broadcast %cst_213 : f32 to vector<16x128xf32>
    %377 = arith.mulf %376, %375 : vector<16x128xf32>
    %378 = math.tanh %377 : vector<16x128xf32>
    %cst_214 = arith.constant 1.000000e+00 : f32
    %379 = vector.broadcast %cst_214 : f32 to vector<16x128xf32>
    %380 = arith.addf %379, %378 : vector<16x128xf32>
    %381 = arith.mulf %370, %380 : vector<16x128xf32>
    %382 = arith.truncf %381 : vector<16x128xf32> to vector<16x128xbf16>
    %c0_215 = arith.constant 0 : index
    %c0_216 = arith.constant 0 : index
    %c0_217 = arith.constant 0 : index
    %383 = vector.load %arg12[%c0_215, %c0_216, %c0_217] : memref<1x128x32xbf16, #tpu.memory_space<vmem>>, vector<1x128x32xbf16>
    %384 = vector.shape_cast %383 : vector<1x128x32xbf16> to vector<128x32xbf16>
    %cst_218 = arith.constant dense<0.000000e+00> : vector<16x32xf32>
    %385 = tpu.matmul %382, %384, %cst_218 {dimension_numbers = #tpu.dot_dimension_numbers<[1], [0], [0], [1], [0, 0, 1, 1], [], []>} : vector<16x128xbf16>, vector<128x32xbf16>, vector<16x32xf32> -> vector<16x32xf32>
    %c0_219 = arith.constant 0 : index
    %c0_220 = arith.constant 0 : index
    %c0_221 = arith.constant 0 : index
    %386 = vector.load %arg13[%c0_219, %c0_220, %c0_221] : memref<1x1x32xf32, #tpu.memory_space<vmem>>, vector<1x1x32xf32>
    %387 = vector.shape_cast %386 : vector<1x1x32xf32> to vector<1x32xf32>
    %388 = vector.broadcast %387 : vector<1x32xf32> to vector<16x32xf32>
    %389 = arith.addf %385, %388 : vector<16x32xf32>
    %390 = arith.addf %389, %360 : vector<16x32xf32>
    %c0_222 = arith.constant 0 : index
    %c0_223 = arith.constant 0 : index
    %c0_224 = arith.constant 0 : index
    %391 = vector.load %arg14[%c0_222, %c0_223, %c0_224] : memref<1x1x32xf32, #tpu.memory_space<vmem>>, vector<1x1x32xf32>
    %392 = vector.shape_cast %391 : vector<1x1x32xf32> to vector<1x32xf32>
    %c0_225 = arith.constant 0 : index
    %c0_226 = arith.constant 0 : index
    %c0_227 = arith.constant 0 : index
    %393 = vector.load %arg15[%c0_225, %c0_226, %c0_227] : memref<1x1x32xf32, #tpu.memory_space<vmem>>, vector<1x1x32xf32>
    %394 = vector.shape_cast %393 : vector<1x1x32xf32> to vector<1x32xf32>
    %cst_228 = arith.constant dense<0.000000e+00> : vector<16xf32>
    %395 = vector.multi_reduction <add>, %390, %cst_228 [1] : vector<16x32xf32> to vector<16xf32>
    %396 = vector.shape_cast %395 : vector<16xf32> to vector<16x1xf32>
    %cst_229 = arith.constant 3.200000e+01 : f32
    %397 = vector.broadcast %cst_229 : f32 to vector<16x1xf32>
    %398 = arith.divf %396, %397 : vector<16x1xf32>
    %399 = vector.broadcast %398 : vector<16x1xf32> to vector<16x32xf32>
    %400 = arith.subf %390, %399 : vector<16x32xf32>
    %401 = arith.mulf %400, %400 : vector<16x32xf32>
    %cst_230 = arith.constant dense<0.000000e+00> : vector<16xf32>
    %402 = vector.multi_reduction <add>, %401, %cst_230 [1] : vector<16x32xf32> to vector<16xf32>
    %403 = vector.shape_cast %402 : vector<16xf32> to vector<16x1xf32>
    %cst_231 = arith.constant 3.200000e+01 : f32
    %404 = vector.broadcast %cst_231 : f32 to vector<16x1xf32>
    %405 = arith.divf %403, %404 : vector<16x1xf32>
    %406 = vector.broadcast %398 : vector<16x1xf32> to vector<16x32xf32>
    %407 = arith.subf %390, %406 : vector<16x32xf32>
    %cst_232 = arith.constant 9.99999974E-6 : f32
    %408 = vector.broadcast %cst_232 : f32 to vector<16x1xf32>
    %409 = arith.addf %405, %408 : vector<16x1xf32>
    %410 = math.rsqrt %409 : vector<16x1xf32>
    %411 = vector.broadcast %410 : vector<16x1xf32> to vector<16x32xf32>
    %412 = arith.mulf %407, %411 : vector<16x32xf32>
    %413 = vector.broadcast %392 : vector<1x32xf32> to vector<16x32xf32>
    %414 = arith.mulf %412, %413 : vector<16x32xf32>
    %415 = vector.broadcast %394 : vector<1x32xf32> to vector<16x32xf32>
    %416 = arith.addf %414, %415 : vector<16x32xf32>
    %c0_233 = arith.constant 0 : index
    %c0_234 = arith.constant 0 : index
    %417 = vector.load %arg17[%c0_233, %c0_234] : memref<16x32xf32, #tpu.memory_space<vmem>>, vector<16x32xf32>
    tpu.vector_store %arg17[%c0_233, %c0_234], %416 {strides = array<i32>} : memref<16x32xf32, #tpu.memory_space<vmem>>, vector<16x32xf32>,
    %c1_i32 = arith.constant 1 : i32
    %418 = arith.cmpi eq, %arg1, %c1_i32 : i32
    %419 = arith.extui %418 : i1 to i32
    %c0_i32_235 = arith.constant 0 : i32
    %420 = arith.cmpi ne, %419, %c0_i32_235 : i32
    scf.if %420 {
      %c0_236 = arith.constant 0 : index
      %c0_237 = arith.constant 0 : index
      %421 = vector.load %arg16[%c0_236, %c0_237] : memref<16x32xf32, #tpu.memory_space<vmem>>, vector<16x32xf32>
      tpu.vector_store %arg16[%c0_236, %c0_237], %416 {strides = array<i32>} : memref<16x32xf32, #tpu.memory_space<vmem>>, vector<16x32xf32>,
    } else {
    }
    return
  }
  func.func @transform_0(%arg0: i32, %arg1: i32) -> (i32, i32) {
    %c0_i32 = arith.constant 0 : i32
    %c0_i32_0 = arith.constant 0 : i32
    return %arg0, %c0_i32 : i32, i32
  }
  func.func @transform_1(%arg0: i32, %arg1: i32) -> (i32, i32, i32) {
    %c0_i32 = arith.constant 0 : i32
    %c0_i32_0 = arith.constant 0 : i32
    %c0_i32_1 = arith.constant 0 : i32
    return %arg0, %c0_i32, %c0_i32_0 : i32, i32, i32
  }
  func.func @transform_2(%arg0: i32, %arg1: i32) -> (i32, i32, i32) {
    %c0_i32 = arith.constant 0 : i32
    %c0_i32_0 = arith.constant 0 : i32
    %c0_i32_1 = arith.constant 0 : i32
    return %arg1, %c0_i32, %c0_i32_0 : i32, i32, i32
  }
  func.func @transform_3(%arg0: i32, %arg1: i32) -> (i32, i32, i32) {
    %c0_i32 = arith.constant 0 : i32
    %c0_i32_0 = arith.constant 0 : i32
    %c0_i32_1 = arith.constant 0 : i32
    return %arg1, %c0_i32, %c0_i32_0 : i32, i32, i32
  }
  func.func @transform_4(%arg0: i32, %arg1: i32) -> (i32, i32, i32) {
    %c0_i32 = arith.constant 0 : i32
    %c0_i32_0 = arith.constant 0 : i32
    %c0_i32_1 = arith.constant 0 : i32
    return %arg1, %c0_i32, %c0_i32_0 : i32, i32, i32
  }
  func.func @transform_5(%arg0: i32, %arg1: i32) -> (i32, i32, i32) {
    %c0_i32 = arith.constant 0 : i32
    %c0_i32_0 = arith.constant 0 : i32
    %c0_i32_1 = arith.constant 0 : i32
    return %arg1, %c0_i32, %c0_i32_0 : i32, i32, i32
  }
  func.func @transform_6(%arg0: i32, %arg1: i32) -> (i32, i32, i32) {
    %c0_i32 = arith.constant 0 : i32
    %c0_i32_0 = arith.constant 0 : i32
    %c0_i32_1 = arith.constant 0 : i32
    return %arg1, %c0_i32, %c0_i32_0 : i32, i32, i32
  }
  func.func @transform_7(%arg0: i32, %arg1: i32) -> (i32, i32, i32) {
    %c0_i32 = arith.constant 0 : i32
    %c0_i32_0 = arith.constant 0 : i32
    %c0_i32_1 = arith.constant 0 : i32
    return %arg1, %c0_i32, %c0_i32_0 : i32, i32, i32
  }
  func.func @transform_8(%arg0: i32, %arg1: i32) -> (i32, i32, i32) {
    %c0_i32 = arith.constant 0 : i32
    %c0_i32_0 = arith.constant 0 : i32
    %c0_i32_1 = arith.constant 0 : i32
    return %arg1, %c0_i32, %c0_i32_0 : i32, i32, i32
  }
  func.func @transform_9(%arg0: i32, %arg1: i32) -> (i32, i32, i32) {
    %c0_i32 = arith.constant 0 : i32
    %c0_i32_0 = arith.constant 0 : i32
    %c0_i32_1 = arith.constant 0 : i32
    return %arg1, %c0_i32, %c0_i32_0 : i32, i32, i32
  }
  func.func @transform_10(%arg0: i32, %arg1: i32) -> (i32, i32, i32) {
    %c0_i32 = arith.constant 0 : i32
    %c0_i32_0 = arith.constant 0 : i32
    %c0_i32_1 = arith.constant 0 : i32
    return %arg1, %c0_i32, %c0_i32_0 : i32, i32, i32
  }
  func.func @transform_11(%arg0: i32, %arg1: i32) -> (i32, i32, i32) {
    %c0_i32 = arith.constant 0 : i32
    %c0_i32_0 = arith.constant 0 : i32
    %c0_i32_1 = arith.constant 0 : i32
    return %arg1, %c0_i32, %c0_i32_0 : i32, i32, i32
  }
  func.func @transform_12(%arg0: i32, %arg1: i32) -> (i32, i32, i32) {
    %c0_i32 = arith.constant 0 : i32
    %c0_i32_0 = arith.constant 0 : i32
    %c0_i32_1 = arith.constant 0 : i32
    return %arg1, %c0_i32, %c0_i32_0 : i32, i32, i32
  }
  func.func @transform_13(%arg0: i32, %arg1: i32) -> (i32, i32, i32) {
    %c0_i32 = arith.constant 0 : i32
    %c0_i32_0 = arith.constant 0 : i32
    %c0_i32_1 = arith.constant 0 : i32
    return %arg1, %c0_i32, %c0_i32_0 : i32, i32, i32
  }
  func.func @transform_14(%arg0: i32, %arg1: i32) -> (i32, i32) {
    %c0_i32 = arith.constant 0 : i32
    %c0_i32_0 = arith.constant 0 : i32
    return %arg0, %c0_i32 : i32, i32
  }
}

</mosaic_0001>

<bundles_post_ra>
// kernel: tpu_custom_call.1
= control target key start
LH: loop header
LB: loop body
LE: loop exit
PB: predicated region body
PF: predicated region fallthrough
CT: control target
= control target key end

     0   :  { %s4796_s0 = inlined_call_operand.vmem [shape: f32[16,32], index: 0, kind: input, shape index: {}]   ;;  %s4797_s1 = inlined_call_operand.vmem [shape: f32[2,1,8], index: 1, kind: input, shape index: {}]   ;;  %s4798_s2 = inlined_call_operand.vmem [shape: bf16[2,32,96], index: 2, kind: input, shape index: {}]   ;;  %s4799_s3 = inlined_call_operand.vmem [shape: f32[2,1,96], index: 3, kind: input, shape index: {}]   ;;  %s4800_s4 = inlined_call_operand.vmem [shape: bf16[2,32,32], index: 4, kind: input, shape index: {}]   ;;  %s4801_s5 = inlined_call_operand.vmem [shape: f32[2,1,32], index: 5, kind: input, shape index: {}]   ;;  %s4802_s6 = inlined_call_operand.vmem [shape: f32[2,1,32], index: 6, kind: input, shape index: {}]   ;;  %s4803_s7 = inlined_call_operand.vmem [shape: f32[2,1,32], index: 7, kind: input, shape index: {}]   ;;  %s4804_s8 = inlined_call_operand.vmem [shape: bf16[2,32,128], index: 8, kind: input, shape index: {}]   ;;  %s4805_s9 = inlined_call_operand.vmem [shape: f32[2,1,128], index: 9, kind: input, shape index: {}]   ;;  %s4806_s10 = inlined_call_operand.vmem [shape: bf16[2,128,32], index: 10, kind: input, shape index: {}]   ;;  %s4807_s11 = inlined_call_operand.vmem [shape: f32[2,1,32], index: 11, kind: input, shape index: {}]   ;;  %s4808_s12 = inlined_call_operand.vmem [shape: f32[2,1,32], index: 12, kind: input, shape index: {}]   ;;  %s4809_s13 = inlined_call_operand.vmem [shape: f32[2,1,32], index: 13, kind: input, shape index: {}]   ;;  %s4810_s14 = inlined_call_operand.hbm [shape: f32[16,32], index: 14, kind: output, shape index: {}]  }
   0x1   :  { %4815 = sst [smem:[#allocation11_spill]] %s4796_s0 }
   0x2   :  { %4816 = sst [smem:[#allocation12_spill]] %s4797_s1 }
   0x3   :  { %4817 = sst [smem:[#allocation13_spill]] %s4798_s2 }
   0x4   :  { %4818 = sst [smem:[#allocation14_spill]] %s4800_s4 }
   0x5   :  { %4819 = sst [smem:[#allocation15_spill]] %s4810_s14 }
   0x6   :  { %19 = vsyncpa [#allocation6], 0  ;;  %s4095_s29 = smov 0   ;;  %s4097_s30 = smov 0  }
   0x7   :  { %s4099_s15 = smov 0  }
   0x8 LB: > { %4820 = sst [smem:[#allocation8_spill]] %s3980_s30  ;;  %s34_s17 = sadd.s32 1, %s3980_s30  ;;  %s3984_s15 = sphi %s4099_s15, %s25_s15   ;;  %s3980_s30 = sphi %s4097_s30, %s4841_s30   ;;  %s3976_s29 = sphi %s4095_s29, %s4840_s29  }
   0x9   : > { %4821 = sst [smem:[#allocation9_spill]] %s3984_s15  ;;  %p35_p0 = scmp.ge.s32.totalorder %s34_s17, 2 }
   0xa   : > { %p3315_p1 = scmp.ge.s32.totalorder %s3984_s15, 1  ;;  %p540_p2 = scmp.lt.s32.totalorder %s3984_s15, 3 }
   0xb   : > { %s4843_s17 = smov (%p35_p0, %s34_s17), 0 }
   0xc   : > { %4822 = sst [smem:[#allocation10_spill]] %s4843_s17  ;;  %p541_p3 = pnand %p3315_p1, %p540_p2 }
   0xd   : > { %p640_p4 = scmp.lt.s32.totalorder (!%p541_p3), %s3976_s29, 1  ;;  %s4823_s2 = sld [smem:[#allocation13_spill]] (!%p541_p3) }
   0xe   : > { %544 = sbr.rel (%p541_p3) target bundleno = 2645 (0xa55), region = 76  ;;  %s4824_s4 = sld [smem:[#allocation14_spill]] (!%p541_p3) }
   0xf   : > { %p3324_p5 = scmp.ne.s32.totalorder (!%p541_p3), %s3976_s29, 0 }
  0x13   : > { %s4118_s18 = scalar_select %p640_p4, %s3976_s29, 1 }
  0x14   : > { %689 = sbr.rel (%p3324_p5) target bundleno = 28 (0x1c), region = 80  ;;  %s4825_s16 = sld [smem:[#allocation11_spill]] (!%p3324_p5) }
  0x15   : > { %s3423_s19 = sshll.u32 %s4118_s18, 4 }
  0x16   : > { %s644_s25 = scalar_lea.vmem %s4823_s2, %s3423_s19  ;;  %s4131_s28 = scalar_lea.vmem %s4824_s4, %s3423_s19 }
  0x17   : > { %s4148_s24 = scalar_lea.vmem %s4804_s8, %s3423_s19  ;;  %s3426_s4 = sshll.u32 %s4118_s18, 6 }
  0x18   : > { %s4158_s30 = scalar_lea.vmem %s4806_s10, %s3426_s4 }
  0x19   : > { %vm692_vm0 = vcmask 261120  }
  0x1a   : > { %v690_v0 = vld [vmem:[%s4825_s16] sm:$0xff]  ;;  %v691_v1 = vld [vmem:[%s4825_s16 + $0x8] sm:$0xff] }
  0x1b   : > { %693 = vst.msk [vmem:[#allocation2] sm:$0xff] %vm692_vm0, %v690_v0  ;;  %694 = vst.msk [vmem:[#allocation2 + $0x8] sm:$0xff] %vm692_vm0, %v691_v1 }
  0x1c PF: > { %v3825_v2 = vld [vmem:[%s644_s25 + $0x8] sm:$0xff]   ;;  %v3986_v3 = vmov 0.0   ;;  %v3826_v4 = vld [vmem:[%s644_s25] sm:$0xff]   ;;  %vm3987_vm1 = vmmov 0   ;;  %vm721_vm2 = vcmask 261120   ;;  %s4826_s14 = scalar_lea.vmem %s4799_s3, %s4118_s18  ;;  %vm774_vm3 = vcmask 781312  }
  0x1d   : > { %3525 = vmatprep.subr.bf16.mxu0 %v3986_v3  ;;  %3545 = vmatprep.subr.bf16.mxu1 %v3986_v3  ;;  %v3325_v8 = vld [vmem:[%s4826_s14] ss:$0 sm:$0xff]  ;;  %s3988_s15 = smov 124   ;;  %s3989_s20 = smov 96   ;;  %vm790_vm4 = vcmask 31744   ;;  %vm837_vm5 = vcmask 64512  }
  0x1e   : > { %3526 = vmatpush3.bf16.msra.mxu0 %v3825_v2  ;;  %3529 = vmatprep.mubr.msk.bf16.mxu0 %vm3987_vm1, %v3986_v3  ;;  %s3990_s19 = smov 88   ;;  %s3991_s23 = smov 92   ;;  %vm855_vm6 = vcmask 1043456   ;;  %vm900_vm7 = vcmask 27648   ;;  %vm1023_vm8 = vcmask 60448   ;;  %vm1146_vm9 = vcmask 93248  }
  0x1f   : > { %3527 = vmatprep.subr.bf16.mxu0 %v3986_v3  ;;  %3547 = vmatprep.mubr.msk.bf16.mxu1 %vm3987_vm1, %v3986_v3  ;;  %s3992_s26 = smov 84   ;;  %s3993_s27 = smov 120   ;;  %vm1269_vm10 = vcmask 126048   ;;  %vm1392_vm11 = vcmask 158848   ;;  %vm1515_vm12 = vcmask 191648   ;;  %vm1638_vm13 = vcmask 224448  }
  0x20   : > { %s3994_s4 = smov 80   ;;  %s3995_s17 = smov 116   ;;  %vm1761_vm14 = vcmask 257248  }
  0x21   : > { %s3996_s25 = smov 76   ;;  %s3997_s21 = smov 112  }
  0x22   : > { %v695_v5 = vld [vmem:[#allocation2] sm:$0xff]  ;;  %v696_v6 = vld [vmem:[#allocation2 + $0x8] sm:$0xff]  ;;  %3528 = vmatpush3.bf16.msra.mxu0 %v3826_v4  ;;  %s3998_s14 = smov 72   ;;  %s3999_s1 = smov 108  }
  0x23   : > { %v697_v7 = vpack.c.bf16 %v696_v6, %v695_v5  ;;  %3533 = vmatprep.subr.bf16.mxu0 %v3986_v3  ;;  %s4000_s22 = smov 68   ;;  %s4001_s0 = smov 104  }
  0x24   : > { %s4002_s2 = smov 100   ;;  %p3418_p6 = scmp.ne.s32.totalorder %s3976_s29, 1 }
  0x25   : > { %3530 = vmatmul.mubr.msk.bf16.vlgmr.msra.gmra.mxu0 %vm721_vm2, %v697_v7 }
  0x26   : > { %3535 = vmatprep.mubr.msk.bf16.mxu0 %vm3987_vm1, %v3986_v3 }
  0xe5   : > { %v759_v9 = vpop.f32.mrf.mxu0 }
  0xe6   : > { %v760_v10 = vadd.f32 %v3325_v8, %v759_v9 }
  0xe7   : > { %v3531_v11 = vpop.f32.mrf.mxu0 }
  0xe8   : > { %v3427_v12 = vpack.c.bf16 %v760_v10, %v760_v10 }
  0xe9   : > { %v762_v13 = vpop.f32.mrf.mxu0 }
  0xea   : > { %775 = vst.msk [vmem:[#allocation3] sm:$0xf] %vm774_vm3, %v3427_v12  ;;  %v763_v14 = vadd.f32 %v3325_v8, %v762_v13 }
  0xeb   : > { %v3532_v15 = vpop.f32.mrf.mxu0 }
  0xec   : > { %v3428_v16 = vpack.c.bf16 %v763_v14, %v763_v14 }
  0xee   : > { %776 = vst.msk [vmem:[#allocation3 + $0x4] sm:$0xf] %vm774_vm3, %v3428_v16 }
  0xf1   : > { %v4195_v17 = vld [vmem:[#allocation3] ss:$0 sps:$4 sm:$0xff]  }
  0xf2   : > { %v4197_v18 = vld [vmem:[#allocation3] sm:$0xf]  ;;  %906 = vrot.lane.b32.xlu1 %v4195_v17, %s3988_s15 }
  0xf3   : > { %v4201_v19 = vcombine.low %v4197_v18, %v4197_v18  ;;  %v4207_v20 = vld [vmem:[#allocation3] ss:$0 sps:$4 sm:$0xff]  }
  0xf4   : > { %v4213_v21 = vld [vmem:[#allocation3] ss:$0 sps:$4 sm:$0xff]  }
  0xf5   : > { %788 = vrot.lane.b32.xlu0 %v4201_v19, %s3989_s20  ;;  %v4219_v22 = vld [vmem:[#allocation3] ss:$0 sps:$4 sm:$0xff]   ;;  %v4236_v26 = vld [vmem:[#allocation3 + $0x4] sm:$0xf] }
  0xf6   : > { %1031 = vrot.lane.b32.xlu1 %v4207_v20, %s3990_s19  ;;  %v4224_v23 = vld [vmem:[#allocation3] ss:$0 sps:$4 sm:$0xff]   ;;  %v4242_v27 = vcombine.low %v4236_v26, %v4236_v26  ;;  %v4247_v28 = vld [vmem:[#allocation3 + $0x4] ss:$0 sps:$4 sm:$0xff]  }
  0xf7   : > { %v4229_v24 = vld [vmem:[#allocation3] ss:$0 sps:$4 sm:$0xff]   ;;  %v4253_v29 = vld [vmem:[#allocation3 + $0x4] ss:$0 sps:$4 sm:$0xff]  }
  0xf8   : > { %v4234_v25 = vld [vmem:[#allocation3] ss:$0 sps:$4 sm:$0xff]   ;;  %v4259_v30 = vld [vmem:[#allocation3 + $0x4] ss:$0 sps:$4 sm:$0xff]  }
  0xf9   : > { %908 = vrot.lane.b32.xlu0 %v4195_v17, %s3991_s23  ;;  %v4264_v31 = vld [vmem:[#allocation3 + $0x4] ss:$0 sps:$4 sm:$0xff]  }
  0xfa   : > { %1154 = vrot.lane.b32.xlu1 %v4213_v21, %s3992_s26  ;;  %v4269_v32 = vld [vmem:[#allocation3 + $0x4] ss:$0 sps:$4 sm:$0xff]  }
  0xfb   : > { %v4274_v33 = vld [vmem:[#allocation3 + $0x4] ss:$0 sps:$4 sm:$0xff]  }
  0xfc   : > { %v4279_v34 = vld [vmem:[#allocation3 + $0x4] ss:$0 sps:$4 sm:$0xff]  }
  0xfd   : > { %1029 = vrot.lane.b32.xlu0 %v4207_v20, %s3993_s27 }
  0xfe   : > { %1277 = vrot.lane.b32.xlu1 %v4219_v22, %s3994_s4 }
 0x101   : > { %1152 = vrot.lane.b32.xlu0 %v4213_v21, %s3995_s17 }
 0x102   : > { %1400 = vrot.lane.b32.xlu1 %v4224_v23, %s3996_s25 }
 0x105   : > { %1275 = vrot.lane.b32.xlu0 %v4219_v22, %s3997_s21 }
 0x106   : > { %1523 = vrot.lane.b32.xlu1 %v4229_v24, %s3998_s14 }
 0x109   : > { %1398 = vrot.lane.b32.xlu0 %v4224_v23, %s3999_s1 }
 0x10a   : > { %1646 = vrot.lane.b32.xlu1 %v4234_v25, %s4000_s22 }
 0x10d   : > { %1521 = vrot.lane.b32.xlu0 %v4229_v24, %s4001_s0 }
 0x10e   : > { %1775 = vrot.lane.b32.xlu1 %v4242_v27, %s3989_s20  ;;  %s4005_s20 = smov 64  }
 0x111   : > { %1644 = vrot.lane.b32.xlu0 %v4234_v25, %s4002_s2 }
 0x112   : > { %1889 = vrot.lane.b32.xlu1 %v4247_v28, %s3988_s15  ;;  %s4003_s15 = smov 60  }
 0x115   : > { %1891 = vrot.lane.b32.xlu0 %v4247_v28, %s3991_s23  ;;  %s4828_s23 = scalar_lea.vmem %s4801_s5, %s4118_s18 }
 0x116   : > { %2011 = vrot.lane.b32.xlu1 %v4253_v29, %s3993_s27  ;;  %s4007_s27 = smov 52  }
 0x119   : > { %2013 = vrot.lane.b32.xlu0 %v4253_v29, %s3990_s19  ;;  %s4833_s19 = scalar_lea.vmem %s4808_s12, %s4118_s18 }
 0x11a   : > { %2133 = vrot.lane.b32.xlu1 %v4259_v30, %s3995_s17  ;;  %s4009_s17 = smov 44  }
 0x11d   : > { %2135 = vrot.lane.b32.xlu0 %v4259_v30, %s3992_s26  ;;  %s4006_s26 = smov 48  }
 0x11e   : > { %2255 = vrot.lane.b32.xlu1 %v4264_v31, %s3997_s21  ;;  %s4011_s21 = smov 4  }
 0x121   : > { %2257 = vrot.lane.b32.xlu0 %v4264_v31, %s3994_s4  ;;  %s4008_s4 = smov 40  }
 0x122   : > { %2377 = vrot.lane.b32.xlu1 %v4269_v32, %s3999_s1  ;;  %s4014_s1 = smov 16  }
 0x125   : > { %2379 = vrot.lane.b32.xlu0 %v4269_v32, %s3996_s25  ;;  %s4010_s25 = smov 36  }
 0x126   : > { %2499 = vrot.lane.b32.xlu1 %v4274_v33, %s4001_s0  ;;  %s4827_s0 = sld [smem:[#allocation12_spill]] }
 0x129   : > { %2501 = vrot.lane.b32.xlu0 %v4274_v33, %s3998_s14  ;;  %s4012_s14 = smov 8  }
 0x12a   : > { %2621 = vrot.lane.b32.xlu1 %v4279_v34, %s4002_s2  ;;  %s4015_s2 = smov 20  }
 0x12d   : > { %2623 = vrot.lane.b32.xlu0 %v4279_v34, %s4000_s22  ;;  %s4004_s22 = smov 56  }
 0x12e   : > { %968 = vrot.lane.b32.xlu1 %v4195_v17, %s4003_s15 }
 0x164   : > { %v907_v37 = vpop.permute.xlu1 %906 }
 0x167   : > { %v789_v35 = vpop.permute.xlu0 %788 }
 0x168   : > { %v795_v36 = vsel %vm790_vm4, %v789_v35, 0  ;;  %v1032_v40 = vpop.permute.xlu1 %1031 }
 0x169   : > { %3534 = vmatpush3.bf16.xpose.msra.mxu0 %v795_v36  ;;  %v1037_v41 = vsel %vm790_vm4, %v1032_v40, 0 }
 0x16a   : > { %3539 = vmatprep.subr.bf16.mxu0 %v3986_v3 }
 0x16b   : > { %v909_v38 = vpop.permute.xlu0 %908 }
 0x16c   : > { %v914_v39 = vsel %vm790_vm4, %v909_v38, 0  ;;  %v1155_v42 = vpop.permute.xlu1 %1154 }
 0x16d   : > { %3546 = vmatpush3.bf16.xpose.msra.mxu1 %v914_v39  ;;  %v1160_v44 = vsel %vm790_vm4, %v1155_v42, 0 }
 0x16e   : > { %3557 = vmatprep.subr.bf16.mxu1 %v3986_v3 }
 0x16f   : > { %v1030_v43 = vpop.permute.xlu0 %1029 }
 0x170   : > { %3536 = vmatmul.mubr.msk.bf16.vlgmr.msra.gmra.mxu0 %vm790_vm4, %v4197_v18  ;;  %v1278_v45 = vpop.permute.xlu1 %1277  ;;  %v3331_v18 = vld [vmem:[%s4827_s0] ss:$0 sm:$0xff] }
 0x171   : > { %3541 = vmatprep.mubr.msk.bf16.mxu0 %vm3987_vm1, %v3986_v3  ;;  %v1283_v47 = vsel %vm790_vm4, %v1278_v45, 0 }
 0x173   : > { %v1153_v46 = vpop.permute.xlu0 %1152 }
 0x174   : > { %3548 = vmatmul.mubr.msk.bf16.vlgmr.msra.gmra.mxu1 %vm790_vm4, %v907_v37  ;;  %v1401_v48 = vpop.permute.xlu1 %1400 }
 0x175   : > { %3558 = vmatpush3.bf16.xpose.msra.mxu1 %v1037_v41  ;;  %3559 = vmatprep.mubr.msk.bf16.mxu1 %vm3987_vm1, %v3986_v3  ;;  %v1406_v50 = vsel %vm790_vm4, %v1401_v48, 0 }
 0x176   : > { %3569 = vmatprep.subr.bf16.mxu1 %v3986_v3 }
 0x177   : > { %v1276_v49 = vpop.permute.xlu0 %1275 }
 0x178   : > { %v1524_v51 = vpop.permute.xlu1 %1523 }
 0x179   : > { %v1529_v53 = vsel %vm790_vm4, %v1524_v51, 0 }
 0x17b   : > { %v1399_v52 = vpop.permute.xlu0 %1398 }
 0x17c   : > { %3560 = vmatmul.mubr.msk.bf16.vlgmr.msra.gmra.mxu1 %vm790_vm4, %v1030_v43  ;;  %v1647_v54 = vpop.permute.xlu1 %1646 }
 0x17d   : > { %3570 = vmatpush3.bf16.xpose.msra.mxu1 %v1160_v44  ;;  %3571 = vmatprep.mubr.msk.bf16.mxu1 %vm3987_vm1, %v3986_v3  ;;  %v1652_v56 = vsel %vm790_vm4, %v1647_v54, 0 }
 0x17e   : > { %3581 = vmatprep.subr.bf16.mxu1 %v3986_v3 }
 0x17f   : > { %v1522_v55 = vpop.permute.xlu0 %1521 }
 0x180   : > { %v1776_v57 = vpop.permute.xlu1 %1775 }
 0x181   : > { %v1781_v59 = vsel %vm790_vm4, %v1776_v57, 0 }
 0x183   : > { %v1645_v58 = vpop.permute.xlu0 %1644 }
 0x184   : > { %3572 = vmatmul.mubr.msk.bf16.vlgmr.msra.gmra.mxu1 %vm790_vm4, %v1153_v46  ;;  %v1890_v63 = vpop.permute.xlu1 %1889 }
 0x185   : > { %3582 = vmatpush3.bf16.xpose.msra.mxu1 %v1283_v47  ;;  %3583 = vmatprep.mubr.msk.bf16.mxu1 %vm3987_vm1, %v3986_v3 }
 0x186   : > { %3593 = vmatprep.subr.bf16.mxu1 %v3986_v3 }
 0x187   : > { %v1892_v60 = vpop.permute.xlu0 %1891 }
 0x188   : > { %v1897_v61 = vsel %vm790_vm4, %v1892_v60, 0  ;;  %v2012_v2 = vpop.permute.xlu1 %2011 }
 0x18b   : > { %v2014_v62 = vpop.permute.xlu0 %2013 }
 0x18c   : > { %3584 = vmatmul.mubr.msk.bf16.vlgmr.msra.gmra.mxu1 %vm790_vm4, %v1276_v49  ;;  %v2019_v0 = vsel %vm790_vm4, %v2014_v62, 0  ;;  %v2134_v6 = vpop.permute.xlu1 %2133 }
 0x18d   : > { %3594 = vmatpush3.bf16.xpose.msra.mxu1 %v1406_v50  ;;  %3595 = vmatprep.mubr.msk.bf16.mxu1 %vm3987_vm1, %v3986_v3 }
 0x18e   : > { %3605 = vmatprep.subr.bf16.mxu1 %v3986_v3 }
 0x18f   : > { %v2136_v1 = vpop.permute.xlu0 %2135 }
 0x190   : > { %v2141_v4 = vsel %vm790_vm4, %v2136_v1, 0  ;;  %v2256_v9 = vpop.permute.xlu1 %2255 }
 0x193   : > { %v2258_v5 = vpop.permute.xlu0 %2257 }
 0x194   : > { %3596 = vmatmul.mubr.msk.bf16.vlgmr.msra.gmra.mxu1 %vm790_vm4, %v1399_v52  ;;  %v2263_v7 = vsel %vm790_vm4, %v2258_v5, 0  ;;  %v2378_v12 = vpop.permute.xlu1 %2377 }
 0x195   : > { %3606 = vmatpush3.bf16.xpose.msra.mxu1 %v1529_v53  ;;  %3607 = vmatprep.mubr.msk.bf16.mxu1 %vm3987_vm1, %v3986_v3 }
 0x196   : > { %3617 = vmatprep.subr.bf16.mxu1 %v3986_v3 }
 0x197   : > { %v2380_v8 = vpop.permute.xlu0 %2379 }
 0x198   : > { %v2385_v10 = vsel %vm790_vm4, %v2380_v8, 0  ;;  %v2500_v15 = vpop.permute.xlu1 %2499 }
 0x19b   : > { %v2502_v11 = vpop.permute.xlu0 %2501 }
 0x19c   : > { %3608 = vmatmul.mubr.msk.bf16.vlgmr.msra.gmra.mxu1 %vm790_vm4, %v1522_v55  ;;  %v2507_v13 = vsel %vm790_vm4, %v2502_v11, 0  ;;  %v2622_v17 = vpop.permute.xlu1 %2621 }
 0x19d   : > { %3618 = vmatpush3.bf16.xpose.msra.mxu1 %v1652_v56  ;;  %3619 = vmatprep.mubr.msk.bf16.mxu1 %vm3987_vm1, %v3986_v3 }
 0x19e   : > { %3629 = vmatprep.subr.bf16.mxu1 %v3986_v3 }
 0x19f   : > { %v2624_v14 = vpop.permute.xlu0 %2623 }
 0x1a0   : > { %v2629_v16 = vsel %vm790_vm4, %v2624_v14, 0  ;;  %v4401_v14 = vld [vmem:[%s4827_s0 + $0x1] ss:$0 sm:$0xff] }
 0x1a4   : > { %3620 = vmatmul.mubr.msk.bf16.vlgmr.msra.gmra.mxu1 %vm790_vm4, %v1645_v58 }
 0x1a5   : > { %3630 = vmatpush3.bf16.xpose.msra.mxu1 %v1781_v59  ;;  %3631 = vmatprep.mubr.msk.bf16.mxu1 %vm3987_vm1, %v3986_v3 }
 0x1a6   : > { %3641 = vmatprep.subr.bf16.mxu1 %v3986_v3 }
 0x1ac   : > { %3632 = vmatmul.mubr.msk.bf16.vlgmr.msra.gmra.mxu1 %vm790_vm4, %v4236_v26 }
 0x1ad   : > { %3642 = vmatpush3.bf16.xpose.msra.mxu1 %v1897_v61  ;;  %3643 = vmatprep.mubr.msk.bf16.mxu1 %vm3987_vm1, %v3986_v3 }
 0x1ae   : > { %3653 = vmatprep.subr.bf16.mxu1 %v3986_v3 }
 0x1b4   : > { %3644 = vmatmul.mubr.msk.bf16.vlgmr.msra.gmra.mxu1 %vm790_vm4, %v1890_v63 }
 0x1b5   : > { %3654 = vmatpush3.bf16.xpose.msra.mxu1 %v2019_v0  ;;  %3655 = vmatprep.mubr.msk.bf16.mxu1 %vm3987_vm1, %v3986_v3 }
 0x1b6   : > { %3665 = vmatprep.subr.bf16.mxu1 %v3986_v3 }
 0x1bc   : > { %3656 = vmatmul.mubr.msk.bf16.vlgmr.msra.gmra.mxu1 %vm790_vm4, %v2012_v2 }
 0x1bd   : > { %3666 = vmatpush3.bf16.xpose.msra.mxu1 %v2141_v4  ;;  %3667 = vmatprep.mubr.msk.bf16.mxu1 %vm3987_vm1, %v3986_v3 }
 0x1be   : > { %3677 = vmatprep.subr.bf16.mxu1 %v3986_v3 }
 0x1c4   : > { %3668 = vmatmul.mubr.msk.bf16.vlgmr.msra.gmra.mxu1 %vm790_vm4, %v2134_v6 }
 0x1c5   : > { %3678 = vmatpush3.bf16.xpose.msra.mxu1 %v2263_v7  ;;  %3679 = vmatprep.mubr.msk.bf16.mxu1 %vm3987_vm1, %v3986_v3 }
 0x1c6   : > { %3689 = vmatprep.subr.bf16.mxu1 %v3986_v3 }
 0x1cc   : > { %3680 = vmatmul.mubr.msk.bf16.vlgmr.msra.gmra.mxu1 %vm790_vm4, %v2256_v9 }
 0x1cd   : > { %3690 = vmatpush3.bf16.xpose.msra.mxu1 %v2385_v10  ;;  %3691 = vmatprep.mubr.msk.bf16.mxu1 %vm3987_vm1, %v3986_v3 }
 0x1ce   : > { %3701 = vmatprep.subr.bf16.mxu1 %v3986_v3 }
 0x1d4   : > { %3692 = vmatmul.mubr.msk.bf16.vlgmr.msra.gmra.mxu1 %vm790_vm4, %v2378_v12 }
 0x1d5   : > { %3702 = vmatpush3.bf16.xpose.msra.mxu1 %v2507_v13  ;;  %3703 = vmatprep.mubr.msk.bf16.mxu1 %vm3987_vm1, %v3986_v3 }
 0x1d6   : > { %3713 = vmatprep.subr.bf16.mxu1 %v3986_v3 }
 0x1dc   : > { %3704 = vmatmul.mubr.msk.bf16.vlgmr.msra.gmra.mxu1 %vm790_vm4, %v2500_v15 }
 0x1dd   : > { %3714 = vmatpush3.bf16.xpose.msra.mxu1 %v2629_v16  ;;  %3715 = vmatprep.mubr.msk.bf16.mxu1 %vm3987_vm1, %v3986_v3 }
 0x1de   : > { %3725 = vmatprep.subr.bf16.mxu1 %v3986_v3 }
 0x1e4   : > { %3716 = vmatmul.mubr.msk.bf16.vlgmr.msra.gmra.mxu1 %vm790_vm4, %v2622_v17 }
 0x1e5   : > { %3729 = vmatprep.mubr.msk.bf16.mxu1 %vm3987_vm1, %v3986_v3 }
 0x230   : > { %v831_v26 = vpop.f32.mrf.mxu0 }
 0x231   : > { %v4370_v35 = vadd.f32 %v3331_v18, %v831_v26 }
 0x232   : > { %v3537_v36 = vpop.f32.mrf.mxu0 }
 0x233   : > { %v838_v37 = vsel %vm837_vm5, %v4370_v35, -inf }
 0x234   : > { %v950_v38 = vpop.f32.mrf.mxu1  ;;  %839 = vmax.xlane.f32.xlu0 %v838_v37  ;;  %v834_v39 = vpop.f32.mrf.mxu0 }
 0x235   : > { %v4374_v40 = vadd.f32 %v3331_v18, %v950_v38 }
 0x236   : > { %v3538_v41 = vpop.f32.mrf.mxu0  ;;  %v3549_v42 = vpop.f32.mrf.mxu1 }
 0x237   : > { %v956_v43 = vsel %vm837_vm5, %v4374_v40, -inf }
 0x238   : > { %v953_v44 = vpop.f32.mrf.mxu1  ;;  %957 = vmax.xlane.f32.xlu1 %v956_v43 }
 0x23a   : > { %v3550_v45 = vpop.f32.mrf.mxu1 }
 0x23c   : > { %v1073_v46 = vpop.f32.mrf.mxu1 }
 0x23d   : > { %v4382_v2 = vadd.f32 %v3331_v18, %v1073_v46 }
 0x23e   : > { %v3561_v47 = vpop.f32.mrf.mxu1 }
 0x23f   : > { %v1079_v7 = vsel %vm837_vm5, %v4382_v2, -inf }
 0x240   : > { %v1076_v48 = vpop.f32.mrf.mxu1 }
 0x242   : > { %v3562_v49 = vpop.f32.mrf.mxu1 }
 0x244   : > { %v1196_v50 = vpop.f32.mrf.mxu1 }
 0x245   : > { %v4384_v5 = vadd.f32 %v3331_v18, %v1196_v50 }
 0x246   : > { %v3573_v51 = vpop.f32.mrf.mxu1 }
 0x247   : > { %v1202_v13 = vsel %vm837_vm5, %v4384_v5, -inf }
 0x248   : > { %v1199_v52 = vpop.f32.mrf.mxu1 }
 0x249   : > { %1091 = vrot.lane.b32.xlu1 %v4207_v20, %s4004_s22 }
 0x24a   : > { %v3574_v53 = vpop.f32.mrf.mxu1  ;;  %850 = vrot.lane.b32.xlu0 %v4201_v19, %s4005_s20 }
 0x24c   : > { %v1319_v54 = vpop.f32.mrf.mxu1 }
 0x24d   : > { %v4386_v6 = vadd.f32 %v3331_v18, %v1319_v54 }
 0x24e   : > { %v3585_v55 = vpop.f32.mrf.mxu1 }
 0x24f   : > { %v1325_v12 = vsel %vm837_vm5, %v4386_v6, -inf }
 0x250   : > { %v1322_v56 = vpop.f32.mrf.mxu1 }
 0x252   : > { %v3586_v57 = vpop.f32.mrf.mxu1 }
 0x254   : > { %v1442_v58 = vpop.f32.mrf.mxu1 }
 0x255   : > { %v4390_v9 = vadd.f32 %v3331_v18, %v1442_v58 }
 0x256   : > { %v3597_v59 = vpop.f32.mrf.mxu1 }
 0x257   : > { %v1448_v37 = vsel %vm837_vm5, %v4390_v9, -inf }
 0x258   : > { %v1445_v60 = vpop.f32.mrf.mxu1 }
 0x25a   : > { %v3598_v61 = vpop.f32.mrf.mxu1 }
 0x25c   : > { %v1565_v62 = vpop.f32.mrf.mxu1 }
 0x25d   : > { %v4392_v10 = vadd.f32 %v3331_v18, %v1565_v62 }
 0x25e   : > { %v3609_v63 = vpop.f32.mrf.mxu1 }
 0x25f   : > { %v1571_v36 = vsel %vm837_vm5, %v4392_v10, -inf }
 0x260   : > { %v1568_v0 = vpop.f32.mrf.mxu1 }
 0x262   : > { %v3610_v1 = vpop.f32.mrf.mxu1 }
 0x264   : > { %v1688_v20 = vpop.f32.mrf.mxu1 }
 0x265   : > { %v4403_v16 = vadd.f32 %v3331_v18, %v1688_v20 }
 0x266   : > { %v3621_v4 = vpop.f32.mrf.mxu1 }
 0x267   : > { %v1694_v18 = vsel %vm837_vm5, %v4403_v16, -inf }
 0x268   : > { %v1691_v19 = vpop.f32.mrf.mxu1 }
 0x269   : > { %1080 = vmax.xlane.f32.xlu0 %v1079_v7 }
 0x26a   : > { %v3622_v8 = vpop.f32.mrf.mxu1 }
 0x26c   : > { %v1817_v11 = vpop.f32.mrf.mxu1 }
 0x26d   : > { %1326 = vmax.xlane.f32.xlu1 %v1325_v12  ;;  %1203 = vmax.xlane.f32.xlu0 %v1202_v13  ;;  %v4406_v17 = vadd.f32 %v4401_v14, %v1817_v11 }
 0x26e   : > { %v3633_v15 = vpop.f32.mrf.mxu1 }
 0x26f   : > { %v1823_v41 = vsel %vm837_vm5, %v4406_v17, -inf }
 0x270   : > { %v1820_v26 = vpop.f32.mrf.mxu1 }
 0x271   : > { %1572 = vmax.xlane.f32.xlu1 %v1571_v36  ;;  %1449 = vmax.xlane.f32.xlu0 %v1448_v37 }
 0x272   : > { %v3634_v38 = vpop.f32.mrf.mxu1 }
 0x274   : > { %v1933_v39 = vpop.f32.mrf.mxu1 }
 0x275   : > { %1824 = vmax.xlane.f32.xlu1 %v1823_v41  ;;  %1695 = vmax.xlane.f32.xlu0 %v1694_v18  ;;  %v4421_v1 = vadd.f32 %v4401_v14, %v1933_v39  ;;  %v4455_v18 = vpop.permute.xlu1 %968 }
 0x276   : > { %v3645_v42 = vpop.f32.mrf.mxu1 }
 0x277   : > { %v1939_v11 = vsel %vm837_vm5, %v4421_v1, -inf }
 0x278   : > { %v1936_v43 = vpop.f32.mrf.mxu1 }
 0x27a   : > { %v3646_v44 = vpop.f32.mrf.mxu1 }
 0x27c   : > { %v2055_v45 = vpop.f32.mrf.mxu1 }
 0x27d   : > { %v4424_v20 = vadd.f32 %v4401_v14, %v2055_v45 }
 0x27e   : > { %v3657_v46 = vpop.f32.mrf.mxu1 }
 0x27f   : > { %v2061_v8 = vsel %vm837_vm5, %v4424_v20, -inf }
 0x280   : > { %v2058_v47 = vpop.f32.mrf.mxu1 }
 0x282   : > { %v3658_v48 = vpop.f32.mrf.mxu1 }
 0x284   : > { %v2177_v49 = vpop.f32.mrf.mxu1 }
 0x285   : > { %v4427_v19 = vadd.f32 %v4401_v14, %v2177_v49 }
 0x286   : > { %1337 = vrot.lane.b32.xlu1 %v4219_v22, %s4006_s26  ;;  %v3669_v50 = vpop.f32.mrf.mxu1 }
 0x287   : > { %v2183_v26 = vsel %vm837_vm5, %v4427_v19, -inf }
 0x288   : > { %v2180_v51 = vpop.f32.mrf.mxu1 }
 0x28a   : > { %v3670_v52 = vpop.f32.mrf.mxu1 }
 0x28b   : > { %1214 = vrot.lane.b32.xlu0 %v4213_v21, %s4007_s27 }
 0x28c   : > { %v2299_v53 = vpop.f32.mrf.mxu1 }
 0x28d   : > { %v4437_v13 = vadd.f32 %v4401_v14, %v2299_v53 }
 0x28e   : > { %v3681_v54 = vpop.f32.mrf.mxu1 }
 0x28f   : > { %v2305_v37 = vsel %vm837_vm5, %v4437_v13, -inf }
 0x290   : > { %v2302_v55 = vpop.f32.mrf.mxu1 }
 0x292   : > { %v3682_v56 = vpop.f32.mrf.mxu1 }
 0x294   : > { %v2421_v57 = vpop.f32.mrf.mxu1 }
 0x295   : > { %v4444_v36 = vadd.f32 %v4401_v14, %v2421_v57 }
 0x296   : > { %v3693_v58 = vpop.f32.mrf.mxu1 }
 0x297   : > { %v2427_v39 = vsel %vm837_vm5, %v4444_v36, -inf }
 0x298   : > { %v2424_v59 = vpop.f32.mrf.mxu1 }
 0x29a   : > { %v3694_v60 = vpop.f32.mrf.mxu1 }
 0x29c   : > { %v2543_v61 = vpop.f32.mrf.mxu1 }
 0x29d   : > { %v4449_v38 = vadd.f32 %v4401_v14, %v2543_v61 }
 0x29e   : > { %v3705_v62 = vpop.f32.mrf.mxu1 }
 0x29f   : > { %v2549_v41 = vsel %vm837_vm5, %v4449_v38, -inf }
 0x2a0   : > { %v2546_v63 = vpop.f32.mrf.mxu1 }
 0x2a2   : > { %v3706_v0 = vpop.f32.mrf.mxu1 }
 0x2a4   : > { %v2665_v22 = vpop.f32.mrf.mxu1 }
 0x2a5   : > { %v4430_v7 = vadd.f32 %v4401_v14, %v2665_v22 }
 0x2a6   : > { %v3717_v21 = vpop.f32.mrf.mxu1 }
 0x2a7   : > { %v2671_v15 = vsel %vm837_vm5, %v4430_v7, -inf }
 0x2a8   : > { %v2668_v4 = vpop.f32.mrf.mxu1 }
 0x2aa   : > { %2062 = vmax.xlane.f32.xlu1 %v2061_v8  ;;  %v3718_v12 = vpop.f32.mrf.mxu1  ;;  %1940 = vmax.xlane.f32.xlu0 %v1939_v11 }
 0x2ae   : > { %2672 = vmax.xlane.f32.xlu1 %v2671_v15  ;;  %2184 = vmax.xlane.f32.xlu0 %v2183_v26 }
 0x2b2   : > { %2306 = vmax.xlane.f32.xlu0 %v2305_v37 }
 0x2b6   : > { %2428 = vmax.xlane.f32.xlu0 %v2427_v39 }
 0x2ba   : > { %2550 = vmax.xlane.f32.xlu0 %v2549_v41 }
 0x2bd   : > { %v840_v42 = vpop.xlane.xlu0 %839 }
 0x2be   : > { %v841_v43 = vsub.f32 %v4370_v35, %v840_v42 }
 0x2c0   : > { %v842_v44 = vmul.f32 1.442695, %v841_v43 }
 0x2c1   : > { %v958_v45 = vpop.xlane.xlu1 %957  ;;  %v851_v46 = vpop.permute.xlu0 %850 }
 0x2c2   : > { %3856 = vpow2.f32 %v842_v44  ;;  %v959_v14 = vsub.f32 %v4374_v40, %v958_v45  ;;  %v857_v47 = vsel %vm855_vm6, %v851_v46, 0 }
 0x2c3   : > { %3540 = vmatpush3.bf16.msra.mxu0 %v857_v47 }
 0x2c4   : > { %v960_v48 = vmul.f32 1.442695, %v959_v14  ;;  %3551 = vmatprep.subr.bf16.mxu0 %v3986_v3 }
 0x2c5   : > { %v4469_v40 = vpop.permute.xlu1 %1091 }
 0x2c6   : > { %3858 = vpow2.f32 %v960_v48 }
 0x2cf   : > { %v4461_v49 = vpop.eup %3856 }
 0x2d0   : > { %v844_v50 = vsel %vm837_vm5, %v4461_v49, 0.0 }
 0x2d1   : > { %845 = vadd.xlane.f32.xlu1 %v844_v50 }
 0x2d3   : > { %v4465_v35 = vpop.eup %3858 }
 0x2d4   : > { %v962_v51 = vsel %vm837_vm5, %v4465_v35, 0.0 }
 0x2d5   : > { %963 = vadd.xlane.f32.xlu1 %v962_v51 }
 0x2f2   : > { %v1081_v52 = vpop.xlane.xlu0 %1080 }
 0x2f3   : > { %v1082_v53 = vsub.f32 %v4382_v2, %v1081_v52 }
 0x2f5   : > { %v1083_v54 = vmul.f32 1.442695, %v1082_v53 }
 0x2f6   : > { %v1327_v55 = vpop.xlane.xlu1 %1326  ;;  %v1204_v56 = vpop.xlane.xlu0 %1203 }
 0x2f7   : > { %3860 = vpow2.f32 %v1083_v54  ;;  %v1328_v57 = vsub.f32 %v4386_v6, %v1327_v55  ;;  %v1205_v58 = vsub.f32 %v4384_v5, %v1204_v56 }
 0x2f9   : > { %v1206_v59 = vmul.f32 1.442695, %v1205_v58  ;;  %v1329_v60 = vmul.f32 1.442695, %v1328_v57 }
 0x2fa   : > { %v1573_v61 = vpop.xlane.xlu1 %1572  ;;  %v1450_v62 = vpop.xlane.xlu0 %1449 }
 0x2fb   : > { %v1574_v63 = vsub.f32 %v4392_v10, %v1573_v61  ;;  %v1451_v0 = vsub.f32 %v4390_v9, %v1450_v62  ;;  %3862 = vpow2.f32 %v1206_v59 }
 0x2fc   : > { %3864 = vpow2.f32 %v1329_v60 }
 0x2fd   : > { %v1452_v22 = vmul.f32 1.442695, %v1451_v0  ;;  %v1575_v2 = vmul.f32 1.442695, %v1574_v63 }
 0x2fe   : > { %v1696_v21 = vpop.xlane.xlu0 %1695  ;;  %v1825_v42 = vpop.xlane.xlu1 %1824 }
 0x2ff   : > { %v1697_v4 = vsub.f32 %v4403_v16, %v1696_v21  ;;  %3866 = vpow2.f32 %v1452_v22  ;;  %v1826_v43 = vsub.f32 %v4406_v17, %v1825_v42 }
 0x300   : > { %3868 = vpow2.f32 %v1575_v2 }
 0x301   : > { %v1698_v6 = vmul.f32 1.442695, %v1697_v4  ;;  %v1827_v46 = vmul.f32 1.442695, %v1826_v43 }
 0x302   : > { %v4508_v44 = vpop.permute.xlu0 %1214  ;;  %v4510_v45 = vpop.permute.xlu1 %1337 }
 0x303   : > { %3870 = vpow2.f32 %v1698_v6 }
 0x304   : > { %v4477_v8 = vpop.eup %3860  ;;  %3872 = vpow2.f32 %v1827_v46  ;;  %v974_v46 = vsel %vm855_vm6, %v4455_v18, 0 }
 0x305   : > { %v1085_v5 = vsel %vm837_vm5, %v4477_v8, 0.0 }
 0x306   : > { %1086 = vadd.xlane.f32.xlu1 %v1085_v5 }
 0x308   : > { %v4481_v10 = vpop.eup %3862 }
 0x309   : > { %v1208_v9 = vsel %vm837_vm5, %v4481_v10, 0.0  ;;  %v4485_v11 = vpop.eup %3864 }
 0x30a   : > { %1209 = vadd.xlane.f32.xlu1 %v1208_v9  ;;  %v1331_v16 = vsel %vm837_vm5, %v4485_v11, 0.0 }
 0x30c   : > { %v4487_v12 = vpop.eup %3866 }
 0x30d   : > { %v1454_v15 = vsel %vm837_vm5, %v4487_v12, 0.0  ;;  %v4493_v26 = vpop.eup %3868 }
 0x30e   : > { %1332 = vadd.xlane.f32.xlu1 %v1331_v16  ;;  %1455 = vadd.xlane.f32.xlu0 %v1454_v15  ;;  %v1577_v37 = vsel %vm837_vm5, %v4493_v26, 0.0 }
 0x310   : > { %v4497_v39 = vpop.eup %3870 }
 0x311   : > { %v1700_v41 = vsel %vm837_vm5, %v4497_v39, 0.0 }
 0x312   : > { %1578 = vadd.xlane.f32.xlu1 %v1577_v37 }
 0x316   : > { %1701 = vadd.xlane.f32.xlu1 %v1700_v41 }
 0x324   : > { %1583 = vrot.lane.b32.xlu0 %v4229_v24, %s4008_s4 }
 0x327   : > { %1460 = vrot.lane.b32.xlu1 %v4224_v23, %s4009_s17 }
 0x328   : > { %1706 = vrot.lane.b32.xlu0 %v4234_v25, %s4010_s25 }
 0x333   : > { %v1941_v14 = vpop.xlane.xlu0 %1940  ;;  %v2063_v47 = vpop.xlane.xlu1 %2062 }
 0x334   : > { %v1942_v24 = vsub.f32 %v4421_v1, %v1941_v14  ;;  %v2064_v48 = vsub.f32 %v4424_v20, %v2063_v47  ;;  %v4517_v1 = vpop.eup %3872 }
 0x336   : > { %v1943_v23 = vmul.f32 1.442695, %v1942_v24  ;;  %v2065_v51 = vmul.f32 1.442695, %v2064_v48 }
 0x337   : > { %v2185_v50 = vpop.xlane.xlu0 %2184  ;;  %v2673_v60 = vpop.xlane.xlu1 %2672 }
 0x338   : > { %3874 = vpow2.f32 %v1943_v23  ;;  %v2186_v25 = vsub.f32 %v4427_v19, %v2185_v50  ;;  %v1829_v19 = vsel %vm837_vm5, %v4517_v1, 0.0  ;;  %v1343_v50 = vsel %vm855_vm6, %v4510_v45, 0 }
 0x339   : > { %3876 = vpow2.f32 %v2065_v51 }
 0x33a   : > { %v2187_v17 = vmul.f32 1.442695, %v2186_v25 }
 0x33b   : > { %v2307_v52 = vpop.xlane.xlu0 %2306 }
 0x33c   : > { %v2308_v53 = vsub.f32 %v4437_v13, %v2307_v52  ;;  %3878 = vpow2.f32 %v2187_v17  ;;  %v2674_v13 = vsub.f32 %v4430_v7, %v2673_v60 }
 0x33e   : > { %v2309_v55 = vmul.f32 1.442695, %v2308_v53  ;;  %v2675_v63 = vmul.f32 1.442695, %v2674_v13 }
 0x33f   : > { %v2429_v54 = vpop.xlane.xlu0 %2428 }
 0x340   : > { %v2430_v56 = vsub.f32 %v4444_v36, %v2429_v54  ;;  %3880 = vpow2.f32 %v2309_v55 }
 0x342   : > { %v2431_v20 = vmul.f32 1.442695, %v2430_v56 }
 0x343   : > { %v2551_v57 = vpop.xlane.xlu0 %2550 }
 0x344   : > { %v2552_v58 = vsub.f32 %v4449_v38, %v2551_v57  ;;  %3882 = vpow2.f32 %v2431_v20 }
 0x345   : > { %v4522_v59 = vpop.eup %3874 }
 0x346   : > { %v2553_v61 = vmul.f32 1.442695, %v2552_v58  ;;  %v1945_v36 = vsel %vm837_vm5, %v4522_v59, 0.0  ;;  %v4527_v62 = vpop.eup %3876 }
 0x347   : > { %1830 = vadd.xlane.f32.xlu0 %v1829_v19  ;;  %v2067_v38 = vsel %vm837_vm5, %v4527_v62, 0.0 }
 0x348   : > { %3884 = vpow2.f32 %v2553_v61 }
 0x349   : > { %v4531_v0 = vpop.eup %3878  ;;  %3886 = vpow2.f32 %v2675_v63 }
 0x34a   : > { %v2189_v7 = vsel %vm837_vm5, %v4531_v0, 0.0 }
 0x34b   : > { %1946 = vadd.xlane.f32.xlu1 %v1945_v36 }
 0x34d   : > { %v4535_v22 = vpop.eup %3880 }
 0x34e   : > { %v2311_v2 = vsel %vm837_vm5, %v4535_v22, 0.0 }
 0x34f   : > { %2068 = vadd.xlane.f32.xlu1 %v2067_v38 }
 0x351   : > { %v4539_v21 = vpop.eup %3882 }
 0x352   : > { %v2433_v6 = vsel %vm837_vm5, %v4539_v21, 0.0 }
 0x353   : > { %2190 = vadd.xlane.f32.xlu1 %v2189_v7 }
 0x355   : > { %v4543_v5 = vpop.eup %3884 }
 0x356   : > { %v2555_v16 = vsel %vm837_vm5, %v4543_v5, 0.0  ;;  %v4549_v15 = vpop.eup %3886 }
 0x357   : > { %2312 = vadd.xlane.f32.xlu1 %v2311_v2  ;;  %v2677_v37 = vsel %vm837_vm5, %v4549_v15, 0.0 }
 0x35a   : > { %v846_v4 = vpop.xlane.xlu1 %845 }
 0x35b   : > { %3888 = vrcp.f32 %v846_v4  ;;  %2434 = vadd.xlane.f32.xlu1 %v2433_v6 }
 0x35d   : > { %1835 = vrot.lane.b32.xlu0 %v4242_v27, %s4005_s20  ;;  %s4017_s20 = smov 28  }
 0x35e   : > { %v964_v9 = vpop.xlane.xlu1 %963 }
 0x35f   : > { %3890 = vrcp.f32 %v964_v9  ;;  %2556 = vadd.xlane.f32.xlu1 %v2555_v16 }
 0x361   : > { %1951 = vrot.lane.b32.xlu0 %v4247_v28, %s4003_s15  ;;  %s4013_s15 = smov 12  }
 0x363   : > { %2678 = vadd.xlane.f32.xlu1 %v2677_v37 }
 0x365   : > { %2073 = vrot.lane.b32.xlu0 %v4253_v29, %s4004_s22  ;;  %s4016_s22 = smov 24  }
 0x368   : > { %v3889_v41 = vpop.eup %3888 }
 0x369   : > { %v848_v27 = vmul.f32 %v3889_v41, %v4461_v49  ;;  %2195 = vrot.lane.b32.xlu0 %v4259_v30, %s4007_s27  ;;  %v1097_v30 = vsel %vm855_vm6, %v4469_v40, 0  ;;  %s4834_s27 = scalar_lea.vmem %s4809_s13, %s4118_s18 }
 0x36b   : > { %v849_v42 = vpack.c.bf16 %v848_v27, %v848_v27 }
 0x36c   : > { %v3891_v43 = vpop.eup %3890 }
 0x36d   : > { %3542 = vmatmul.mubr.msk.bf16.vlgmr.msra.gmra.mxu0 %vm837_vm5, %v849_v42  ;;  %2317 = vrot.lane.b32.xlu0 %v4264_v31, %s4006_s26  ;;  %v966_v28 = vmul.f32 %v3891_v43, %v4465_v35 }
 0x36e   : > { %3552 = vmatpush3.bf16.msra.mxu0 %v974_v46  ;;  %3553 = vmatprep.mubr.msk.bf16.mxu0 %vm3987_vm1, %v3986_v3 }
 0x36f   : > { %3563 = vmatprep.subr.bf16.mxu0 %v3986_v3  ;;  %v967_v29 = vpack.c.bf16 %v966_v28, %v966_v28 }
 0x371   : > { %2561 = vrot.lane.b32.xlu0 %v4274_v33, %s4008_s4 }
 0x374   : > { %2439 = vrot.lane.b32.xlu1 %v4269_v32, %s4009_s17 }
 0x375   : > { %3554 = vmatmul.mubr.msk.bf16.vlgmr.msra.gmra.mxu0 %vm837_vm5, %v967_v29  ;;  %2683 = vrot.lane.b32.xlu0 %v4279_v34, %s4010_s25  ;;  %v1220_v34 = vsel %vm855_vm6, %v4508_v44, 0  ;;  %s4830_s25 = scalar_lea.vmem %s4803_s7, %s4118_s18 }
 0x376   : > { %3564 = vmatpush3.bf16.msra.mxu0 %v1097_v30  ;;  %3565 = vmatprep.mubr.msk.bf16.mxu0 %vm3987_vm1, %v3986_v3 }
 0x377   : > { %3575 = vmatprep.subr.bf16.mxu0 %v3986_v3 }
 0x38f   : > { %v1087_v31 = vpop.xlane.xlu1 %1086 }
 0x390   : > { %3892 = vrcp.f32 %v1087_v31 }
 0x393   : > { %v1210_v33 = vpop.xlane.xlu1 %1209 }
 0x394   : > { %3894 = vrcp.f32 %v1210_v33 }
 0x397   : > { %v1333_v18 = vpop.xlane.xlu1 %1332  ;;  %v1456_v40 = vpop.xlane.xlu0 %1455 }
 0x398   : > { %3896 = vrcp.f32 %v1333_v18 }
 0x399   : > { %3898 = vrcp.f32 %v1456_v40 }
 0x39b   : > { %v1579_v47 = vpop.xlane.xlu1 %1578  ;;  %v1584_v17 = vpop.permute.xlu0 %1583 }
 0x39c   : > { %3900 = vrcp.f32 %v1579_v47 }
 0x39d   : > { %v3893_v49 = vpop.eup %3892 }
 0x39e   : > { %v1089_v32 = vmul.f32 %v3893_v49, %v4477_v8 }
 0x39f   : > { %v1702_v23 = vpop.xlane.xlu1 %1701  ;;  %v1707_v56 = vpop.permute.xlu0 %1706 }
 0x3a0   : > { %v1090_v35 = vpack.c.bf16 %v1089_v32, %v1089_v32  ;;  %3902 = vrcp.f32 %v1702_v23 }
 0x3a1   : > { %v3895_v14 = vpop.eup %3894 }
 0x3a2   : > { %3566 = vmatmul.mubr.msk.bf16.vlgmr.msra.gmra.mxu0 %vm837_vm5, %v1090_v35  ;;  %v1212_v24 = vmul.f32 %v3895_v14, %v4481_v10 }
 0x3a3   : > { %3576 = vmatpush3.bf16.msra.mxu0 %v1220_v34  ;;  %3577 = vmatprep.mubr.msk.bf16.mxu0 %vm3987_vm1, %v3986_v3  ;;  %v1461_v51 = vpop.permute.xlu1 %1460 }
 0x3a4   : > { %3587 = vmatprep.subr.bf16.mxu0 %v3986_v3  ;;  %v1213_v48 = vpack.c.bf16 %v1212_v24, %v1212_v24  ;;  %v1466_v52 = vsel %vm855_vm6, %v1461_v51, 0 }
 0x3a5   : > { %v3897_v8 = vpop.eup %3896 }
 0x3a6   : > { %v1335_v44 = vmul.f32 %v3897_v8, %v4485_v11  ;;  %v3899_v10 = vpop.eup %3898  ;;  %v1589_v11 = vsel %vm855_vm6, %v1584_v17, 0 }
 0x3a7   : > { %v1458_v45 = vmul.f32 %v3899_v10, %v4487_v12  ;;  %v1712_v12 = vsel %vm855_vm6, %v1707_v56, 0 }
 0x3a8   : > { %v1336_v25 = vpack.c.bf16 %v1335_v44, %v1335_v44 }
 0x3a9   : > { %v1459_v53 = vpack.c.bf16 %v1458_v45, %v1458_v45  ;;  %v3901_v54 = vpop.eup %3900 }
 0x3aa   : > { %3578 = vmatmul.mubr.msk.bf16.vlgmr.msra.gmra.mxu0 %vm837_vm5, %v1213_v48  ;;  %v1581_v55 = vmul.f32 %v3901_v54, %v4493_v26 }
 0x3ab   : > { %3588 = vmatpush3.bf16.msra.mxu0 %v1343_v50  ;;  %3589 = vmatprep.mubr.msk.bf16.mxu0 %vm3987_vm1, %v3986_v3 }
 0x3ac   : > { %3599 = vmatprep.subr.bf16.mxu0 %v3986_v3  ;;  %v1582_v57 = vpack.c.bf16 %v1581_v55, %v1581_v55 }
 0x3ad   : > { %v3903_v20 = vpop.eup %3902 }
 0x3ae   : > { %v1704_v58 = vmul.f32 %v3903_v20, %v4497_v39 }
 0x3b0   : > { %v1705_v19 = vpack.c.bf16 %v1704_v58, %v1704_v58 }
 0x3b2   : > { %3590 = vmatmul.mubr.msk.bf16.vlgmr.msra.gmra.mxu0 %vm837_vm5, %v1336_v25 }
 0x3b3   : > { %3600 = vmatpush3.bf16.msra.mxu0 %v1466_v52  ;;  %3601 = vmatprep.mubr.msk.bf16.mxu0 %vm3987_vm1, %v3986_v3 }
 0x3b4   : > { %3611 = vmatprep.subr.bf16.mxu0 %v3986_v3 }
 0x3ba   : > { %3602 = vmatmul.mubr.msk.bf16.vlgmr.msra.gmra.mxu0 %vm837_vm5, %v1459_v53 }
 0x3bb   : > { %3612 = vmatpush3.bf16.msra.mxu0 %v1589_v11  ;;  %3613 = vmatprep.mubr.msk.bf16.mxu0 %vm3987_vm1, %v3986_v3 }
 0x3bc   : > { %3623 = vmatprep.subr.bf16.mxu0 %v3986_v3 }
 0x3c2   : > { %3614 = vmatmul.mubr.msk.bf16.vlgmr.msra.gmra.mxu0 %vm837_vm5, %v1582_v57 }
 0x3c3   : > { %3624 = vmatpush3.bf16.msra.mxu0 %v1712_v12  ;;  %3625 = vmatprep.mubr.msk.bf16.mxu0 %vm3987_vm1, %v3986_v3 }
 0x3c4   : > { %3635 = vmatprep.subr.bf16.mxu0 %v3986_v3 }
 0x3ca   : > { %3626 = vmatmul.mubr.msk.bf16.vlgmr.msra.gmra.mxu0 %vm837_vm5, %v1705_v19 }
 0x3cb   : > { %3637 = vmatprep.mubr.msk.bf16.mxu0 %vm3987_vm1, %v3986_v3 }
 0x3d0   : > { %v1831_v26 = vpop.xlane.xlu0 %1830 }
 0x3d1   : > { %3904 = vrcp.f32 %v1831_v26 }
 0x3d4   : > { %v1947_v60 = vpop.xlane.xlu1 %1946  ;;  %v1836_v13 = vpop.permute.xlu0 %1835 }
 0x3d5   : > { %3906 = vrcp.f32 %v1947_v60  ;;  %v1841_v61 = vsel %vm855_vm6, %v1836_v13, 0 }
 0x3d6   : > { %3636 = vmatpush3.bf16.msra.mxu0 %v1841_v61 }
 0x3d7   : > { %3647 = vmatprep.subr.bf16.mxu0 %v3986_v3 }
 0x3d8   : > { %v2069_v36 = vpop.xlane.xlu1 %2068  ;;  %v1952_v38 = vpop.permute.xlu0 %1951 }
 0x3d9   : > { %3908 = vrcp.f32 %v2069_v36  ;;  %v1957_v6 = vsel %vm855_vm6, %v1952_v38, 0 }
 0x3dc   : > { %v2191_v4 = vpop.xlane.xlu1 %2190  ;;  %v2074_v16 = vpop.permute.xlu0 %2073 }
 0x3dd   : > { %3910 = vrcp.f32 %v2191_v4  ;;  %v2079_v27 = vsel %vm855_vm6, %v2074_v16, 0 }
 0x3de   : > { %v3905_v39 = vpop.eup %3904 }
 0x3df   : > { %v1833_v63 = vmul.f32 %v3905_v39, %v4517_v1 }
 0x3e0   : > { %v2313_v37 = vpop.xlane.xlu1 %2312  ;;  %v2196_v46 = vpop.permute.xlu0 %2195 }
 0x3e1   : > { %v1834_v7 = vpack.c.bf16 %v1833_v63, %v1833_v63  ;;  %3912 = vrcp.f32 %v2313_v37  ;;  %v2201_v29 = vsel %vm855_vm6, %v2196_v46, 0 }
 0x3e2   : > { %v3907_v2 = vpop.eup %3906 }
 0x3e3   : > { %3638 = vmatmul.mubr.msk.bf16.vlgmr.msra.gmra.mxu0 %vm837_vm5, %v1834_v7  ;;  %v1949_v9 = vmul.f32 %v3907_v2, %v4522_v59 }
 0x3e4   : > { %3648 = vmatpush3.bf16.msra.mxu0 %v1957_v6  ;;  %3649 = vmatprep.mubr.msk.bf16.mxu0 %vm3987_vm1, %v3986_v3  ;;  %v2435_v43 = vpop.xlane.xlu1 %2434  ;;  %v2318_v33 = vpop.permute.xlu0 %2317 }
 0x3e5   : > { %3659 = vmatprep.subr.bf16.mxu0 %v3986_v3  ;;  %v1950_v1 = vpack.c.bf16 %v1949_v9, %v1949_v9  ;;  %3914 = vrcp.f32 %v2435_v43  ;;  %v2323_v32 = vsel %vm855_vm6, %v2318_v33, 0 }
 0x3e6   : > { %v3909_v41 = vpop.eup %3908 }
 0x3e7   : > { %v2071_v42 = vmul.f32 %v3909_v41, %v4527_v62 }
 0x3e8   : > { %v2557_v30 = vpop.xlane.xlu1 %2556  ;;  %v2562_v24 = vpop.permute.xlu0 %2561 }
 0x3e9   : > { %v2072_v59 = vpack.c.bf16 %v2071_v42, %v2071_v42  ;;  %3916 = vrcp.f32 %v2557_v30 }
 0x3ea   : > { %v3911_v28 = vpop.eup %3910 }
 0x3eb   : > { %3650 = vmatmul.mubr.msk.bf16.vlgmr.msra.gmra.mxu0 %vm837_vm5, %v1950_v1  ;;  %v2193_v31 = vmul.f32 %v3911_v28, %v4531_v0 }
 0x3ec   : > { %3660 = vmatpush3.bf16.msra.mxu0 %v2079_v27  ;;  %3661 = vmatprep.mubr.msk.bf16.mxu0 %vm3987_vm1, %v3986_v3  ;;  %v2679_v49 = vpop.xlane.xlu1 %2678  ;;  %v2684_v50 = vpop.permute.xlu0 %2683 }
 0x3ed   : > { %3671 = vmatprep.subr.bf16.mxu0 %v3986_v3  ;;  %v2194_v62 = vpack.c.bf16 %v2193_v31, %v2193_v31  ;;  %3918 = vrcp.f32 %v2679_v49 }
 0x3ee   : > { %v3913_v18 = vpop.eup %3912 }
 0x3ef   : > { %v2315_v35 = vmul.f32 %v3913_v18, %v4535_v22  ;;  %v2567_v22 = vsel %vm855_vm6, %v2562_v24, 0 }
 0x3f0   : > { %v2440_v40 = vpop.permute.xlu1 %2439 }
 0x3f1   : > { %v2316_v14 = vpack.c.bf16 %v2315_v35, %v2315_v35  ;;  %v2445_v34 = vsel %vm855_vm6, %v2440_v40, 0 }
 0x3f2   : > { %v3915_v0 = vpop.eup %3914 }
 0x3f3   : > { %3662 = vmatmul.mubr.msk.bf16.vlgmr.msra.gmra.mxu0 %vm837_vm5, %v2072_v59  ;;  %v2437_v47 = vmul.f32 %v3915_v0, %v4539_v21  ;;  %v2689_v21 = vsel %vm855_vm6, %v2684_v50, 0 }
 0x3f4   : > { %3672 = vmatpush3.bf16.msra.mxu0 %v2201_v29  ;;  %3673 = vmatprep.mubr.msk.bf16.mxu0 %vm3987_vm1, %v3986_v3 }
 0x3f5   : > { %3683 = vmatprep.subr.bf16.mxu0 %v3986_v3  ;;  %v2438_v48 = vpack.c.bf16 %v2437_v47, %v2437_v47 }
 0x3f6   : > { %v3917_v8 = vpop.eup %3916 }
 0x3f7   : > { %v2559_v23 = vmul.f32 %v3917_v8, %v4543_v5 }
 0x3f9   : > { %v2560_v44 = vpack.c.bf16 %v2559_v23, %v2559_v23 }
 0x3fa   : > { %v3919_v51 = vpop.eup %3918 }
 0x3fb   : > { %3674 = vmatmul.mubr.msk.bf16.vlgmr.msra.gmra.mxu0 %vm837_vm5, %v2194_v62  ;;  %v2681_v25 = vmul.f32 %v3919_v51, %v4549_v15 }
 0x3fc   : > { %3684 = vmatpush3.bf16.msra.mxu0 %v2323_v32  ;;  %3685 = vmatprep.mubr.msk.bf16.mxu0 %vm3987_vm1, %v3986_v3 }
 0x3fd   : > { %3695 = vmatprep.subr.bf16.mxu0 %v3986_v3  ;;  %v2682_v10 = vpack.c.bf16 %v2681_v25, %v2681_v25 }
 0x403   : > { %3686 = vmatmul.mubr.msk.bf16.vlgmr.msra.gmra.mxu0 %vm837_vm5, %v2316_v14 }
 0x404   : > { %3696 = vmatpush3.bf16.msra.mxu0 %v2445_v34  ;;  %3697 = vmatprep.mubr.msk.bf16.mxu0 %vm3987_vm1, %v3986_v3 }
 0x405   : > { %3707 = vmatprep.subr.bf16.mxu0 %v3986_v3 }
 0x40b   : > { %3698 = vmatmul.mubr.msk.bf16.vlgmr.msra.gmra.mxu0 %vm837_vm5, %v2438_v48 }
 0x40c   : > { %3708 = vmatpush3.bf16.msra.mxu0 %v2567_v22  ;;  %3709 = vmatprep.mubr.msk.bf16.mxu0 %vm3987_vm1, %v3986_v3 }
 0x40d   : > { %3719 = vmatprep.subr.bf16.mxu0 %v3986_v3 }
 0x413   : > { %3710 = vmatmul.mubr.msk.bf16.vlgmr.msra.gmra.mxu0 %vm837_vm5, %v2560_v44 }
 0x414   : > { %3720 = vmatpush3.bf16.msra.mxu0 %v2689_v21  ;;  %3721 = vmatprep.mubr.msk.bf16.mxu0 %vm3987_vm1, %v3986_v3 }
 0x415   : > { %3733 = vmatprep.subr.bf16.mxu0 %v3986_v3 }
 0x41b   : > { %3722 = vmatmul.mubr.msk.bf16.vlgmr.msra.gmra.mxu0 %vm837_vm5, %v2682_v10 }
 0x41c   : > { %3737 = vmatprep.mubr.msk.bf16.mxu0 %vm3987_vm1, %v3986_v3 }
 0x42d   : > { %v893_v5 = vpop.f32.mrf.mxu0 }
 0x42e   : > { %v899_v52 = vpack.c.bf16 %v893_v5, %v893_v5 }
 0x42f   : > { %v3543_v45 = vpop.f32.mrf.mxu0 }
 0x430   : > { %901 = vst.msk [vmem:[#allocation4] sm:$0xf] %vm900_vm7, %v899_v52 }
 0x431   : > { %v896_v17 = vpop.f32.mrf.mxu0 }
 0x433   : > { %v3544_v53 = vpop.f32.mrf.mxu0 }
 0x435   : > { %v1010_v54 = vpop.f32.mrf.mxu0 }
 0x436   : > { %v3429_v11 = vpack.c.bf16 %v1010_v54, %v1010_v54 }
 0x437   : > { %v3555_v55 = vpop.f32.mrf.mxu0 }
 0x438   : > { %1020 = vrot.lane.b32.xlu0 %v3429_v11, %s4011_s21 }
 0x439   : > { %v1013_v15 = vpop.f32.mrf.mxu0 }
 0x43a   : > { %v3843_v15 = vld [vmem:[%s4131_s28 + $0x8] sm:$0xff]  }
 0x43b   : > { %v3556_v56 = vpop.f32.mrf.mxu0  ;;  %3726 = vmatpush3.bf16.msra.mxu1 %v3843_v15  ;;  %v3402_v15 = vld [vmem:[%s4830_s25] ss:$0 sm:$0xff] }
 0x43c   : > { %3727 = vmatprep.subr.bf16.mxu1 %v3986_v3 }
 0x462   : > { %v1133_v57 = vpop.f32.mrf.mxu0 }
 0x463   : > { %v3430_v20 = vpack.c.bf16 %v1133_v57, %v1133_v57  ;;  %v3844_v57 = vld [vmem:[%s4131_s28] sm:$0xff]  }
 0x464   : > { %v3567_v12 = vpop.f32.mrf.mxu0  ;;  %3728 = vmatpush3.bf16.msra.mxu1 %v3844_v57 }
 0x465   : > { %1143 = vrot.lane.b32.xlu0 %v3430_v20, %s4012_s14  ;;  %3741 = vmatprep.subr.bf16.mxu1 %v3986_v3 }
 0x466   : > { %v1136_v58 = vpop.f32.mrf.mxu0 }
 0x468   : > { %v3568_v19 = vpop.f32.mrf.mxu0 }
 0x46a   : > { %v1256_v26 = vpop.f32.mrf.mxu0 }
 0x46b   : > { %v3431_v60 = vpack.c.bf16 %v1256_v26, %v1256_v26 }
 0x46c   : > { %v3579_v13 = vpop.f32.mrf.mxu0 }
 0x46d   : > { %1266 = vrot.lane.b32.xlu0 %v3431_v60, %s4013_s15 }
 0x46e   : > { %v1259_v61 = vpop.f32.mrf.mxu0 }
 0x470   : > { %v3580_v36 = vpop.f32.mrf.mxu0 }
 0x472   : > { %v1379_v39 = vpop.f32.mrf.mxu0 }
 0x473   : > { %v3432_v63 = vpack.c.bf16 %v1379_v39, %v1379_v39 }
 0x474   : > { %v3591_v38 = vpop.f32.mrf.mxu0 }
 0x475   : > { %1389 = vrot.lane.b32.xlu0 %v3432_v63, %s4014_s1 }
 0x476   : > { %v1382_v7 = vpop.f32.mrf.mxu0 }
 0x478   : > { %v3592_v2 = vpop.f32.mrf.mxu0 }
 0x47a   : > { %v1502_v4 = vpop.f32.mrf.mxu0 }
 0x47b   : > { %v3433_v6 = vpack.c.bf16 %v1502_v4, %v1502_v4 }
 0x47c   : > { %v3603_v9 = vpop.f32.mrf.mxu0 }
 0x47d   : > { %1512 = vrot.lane.b32.xlu0 %v3433_v6, %s4015_s2 }
 0x47e   : > { %v1505_v16 = vpop.f32.mrf.mxu0 }
 0x480   : > { %v3604_v37 = vpop.f32.mrf.mxu0 }
 0x482   : > { %v1625_v1 = vpop.f32.mrf.mxu0 }
 0x483   : > { %v3434_v14 = vpack.c.bf16 %v1625_v1, %v1625_v1 }
 0x484   : > { %v3615_v41 = vpop.f32.mrf.mxu0 }
 0x486   : > { %v1628_v27 = vpop.f32.mrf.mxu0 }
 0x488   : > { %v3616_v42 = vpop.f32.mrf.mxu0 }
 0x48a   : > { %v1748_v43 = vpop.f32.mrf.mxu0 }
 0x48b   : > { %v3435_v47 = vpack.c.bf16 %v1748_v43, %v1748_v43  ;;  %v3396_v43 = vld [vmem:[%s4828_s23] ss:$0 sm:$0xff] }
 0x48c   : > { %v3627_v46 = vpop.f32.mrf.mxu0 }
 0x48e   : > { %v1751_v59 = vpop.f32.mrf.mxu0 }
 0x490   : > { %v3628_v28 = vpop.f32.mrf.mxu0 }
 0x4a3   : > { %v1877_v29 = vpop.f32.mrf.mxu0 }
 0x4a4   : > { %v1883_v30 = vpack.c.bf16 %v1877_v29, %v1877_v29  ;;  %v3932_v29 = vld [vmem:[#allocation2] sm:$0xff] }
 0x4a5   : > { %v3639_v31 = vpop.f32.mrf.mxu0 }
 0x4a6   : > { %1884 = vst.msk [vmem:[#allocation4 + $0x4] sm:$0xf] %vm900_vm7, %v1883_v30 }
 0x4a7   : > { %v1880_v33 = vpop.f32.mrf.mxu0 }
 0x4a9   : > { %v3640_v62 = vpop.f32.mrf.mxu0 }
 0x4aa   : > { %v1021_v18 = vpop.permute.xlu0 %1020 }
 0x4ab   : > { %1024 = vst.msk [vmem:[#allocation4] sm:$0xf] %vm1023_vm8, %v1021_v18  ;;  %v1993_v49 = vpop.f32.mrf.mxu0 }
 0x4ac   : > { %v3436_v32 = vpack.c.bf16 %v1993_v49, %v1993_v49  ;;  %v3933_v49 = vld [vmem:[#allocation2 + $0x8] sm:$0xff] }
 0x4ad   : > { %v3651_v35 = vpop.f32.mrf.mxu0 }
 0x4ae   : > { %2003 = vrot.lane.b32.xlu0 %v3436_v32, %s4011_s21 }
 0x4af   : > { %v1996_v40 = vpop.f32.mrf.mxu0 }
 0x4b1   : > { %v3652_v0 = vpop.f32.mrf.mxu0 }
 0x4b2   : > { %1635 = vrot.lane.b32.xlu0 %v3434_v14, %s4016_s22 }
 0x4b3   : > { %v2115_v34 = vpop.f32.mrf.mxu0 }
 0x4b4   : > { %v3437_v24 = vpack.c.bf16 %v2115_v34, %v2115_v34 }
 0x4b5   : > { %v3663_v48 = vpop.f32.mrf.mxu0 }
 0x4b6   : > { %1758 = vrot.lane.b32.xlu0 %v3435_v47, %s4017_s20  ;;  %2125 = vrot.lane.b32.xlu1 %v3437_v24, %s4012_s14 }
 0x4b7   : > { %v2118_v8 = vpop.f32.mrf.mxu0 }
 0x4b9   : > { %v3664_v22 = vpop.f32.mrf.mxu0 }
 0x4bb   : > { %v2237_v23 = vpop.f32.mrf.mxu0 }
 0x4bc   : > { %v3438_v50 = vpack.c.bf16 %v2237_v23, %v2237_v23 }
 0x4bd   : > { %v3675_v44 = vpop.f32.mrf.mxu0 }
 0x4be   : > { %2247 = vrot.lane.b32.xlu1 %v3438_v50, %s4013_s15  ;;  %v3846_v50 = vld [vmem:[%s4148_s24 + $0x8] sm:$0xff]   ;;  %v3847_v44 = vld [vmem:[%s4148_s24] sm:$0xff]   ;;  %s4829_s24 = scalar_lea.vmem %s4802_s6, %s4118_s18 }
 0x4bf   : > { %v2240_v51 = vpop.f32.mrf.mxu0  ;;  %3734 = vmatpush3.bf16.msra.mxu0 %v3846_v50 }
 0x4c0   : > { %3735 = vmatprep.subr.bf16.mxu0 %v3986_v3 }
 0x4c1   : > { %v3676_v21 = vpop.f32.mrf.mxu0 }
 0x4c3   : > { %v2359_v25 = vpop.f32.mrf.mxu0  ;;  %3736 = vmatpush3.bf16.msra.mxu0 %v3847_v44 }
 0x4c4   : > { %v3439_v10 = vpack.c.bf16 %v2359_v25, %v2359_v25 }
 0x4c5   : > { %v3687_v5 = vpop.f32.mrf.mxu0 }
 0x4c6   : > { %2369 = vrot.lane.b32.xlu1 %v3439_v10, %s4014_s1  ;;  %s4831_s1 = scalar_lea.vmem %s4805_s9, %s4118_s18 }
 0x4c7   : > { %v2362_v52 = vpop.f32.mrf.mxu0 }
 0x4c9   : > { %v3688_v45 = vpop.f32.mrf.mxu0 }
 0x4cb   : > { %v2481_v17 = vpop.f32.mrf.mxu0 }
 0x4cc   : > { %v3440_v53 = vpack.c.bf16 %v2481_v17, %v2481_v17 }
 0x4cd   : > { %v3699_v54 = vpop.f32.mrf.mxu0 }
 0x4ce   : > { %2491 = vrot.lane.b32.xlu1 %v3440_v53, %s4015_s2  ;;  %v3401_v53 = vld [vmem:[%s4829_s24] ss:$0 sm:$0xff] }
 0x4cf   : > { %v2484_v11 = vpop.f32.mrf.mxu0 }
 0x4d1   : > { %v3700_v55 = vpop.f32.mrf.mxu0 }
 0x4d3   : > { %v2603_v56 = vpop.f32.mrf.mxu0 }
 0x4d4   : > { %v3441_v20 = vpack.c.bf16 %v2603_v56, %v2603_v56 }
 0x4d5   : > { %v3711_v12 = vpop.f32.mrf.mxu0 }
 0x4d6   : > { %2613 = vrot.lane.b32.xlu1 %v3441_v20, %s4016_s22  ;;  %s4832_s22 = scalar_lea.vmem %s4807_s11, %s4118_s18 }
 0x4d7   : > { %v1144_v58 = vpop.permute.xlu0 %1143  ;;  %v2606_v19 = vpop.f32.mrf.mxu0 }
 0x4d8   : > { %1147 = vst.msk [vmem:[#allocation4] sm:$0xf] %vm1146_vm9, %v1144_v58  ;;  %v3848_v58 = vld [vmem:[%s4158_s30 + $0x38] sm:$0xff]   ;;  %v3849_v19 = vld [vmem:[%s4158_s30 + $0x30] sm:$0xff]  }
 0x4d9   : > { %v3712_v26 = vpop.f32.mrf.mxu0 }
 0x4da   : > { %v3850_v26 = vld [vmem:[%s4158_s30 + $0x28] sm:$0xff]  }
 0x4db   : > { %v2725_v60 = vpop.f32.mrf.mxu0 }
 0x4dc   : > { %v3442_v13 = vpack.c.bf16 %v2725_v60, %v2725_v60  ;;  %v3851_v60 = vld [vmem:[%s4158_s30 + $0x20] sm:$0xff]  }
 0x4dd   : > { %v3723_v61 = vpop.f32.mrf.mxu0 }
 0x4de   : > { %2735 = vrot.lane.b32.xlu1 %v3442_v13, %s4017_s20  ;;  %v3852_v13 = vld [vmem:[%s4158_s30 + $0x18] sm:$0xff]   ;;  %v3853_v61 = vld [vmem:[%s4158_s30 + $0x10] sm:$0xff]  }
 0x4df   : > { %v1267_v36 = vpop.permute.xlu0 %1266  ;;  %v2728_v39 = vpop.f32.mrf.mxu0 }
 0x4e0   : > { %1270 = vst.msk [vmem:[#allocation4] sm:$0xf] %vm1269_vm10, %v1267_v36  ;;  %v3854_v36 = vld [vmem:[%s4158_s30 + $0x8] sm:$0xff]   ;;  %v3855_v39 = vld [vmem:[%s4158_s30] sm:$0xff]  }
 0x4e1   : > { %v3724_v63 = vpop.f32.mrf.mxu0 }
 0x4e2   : > { %v3403_v63 = vld [vmem:[%s4831_s1] ss:$0 sm:$0xff] }
 0x4e7   : > { %v1390_v38 = vpop.permute.xlu0 %1389 }
 0x4e8   : > { %1393 = vst.msk [vmem:[#allocation4] sm:$0xf] %vm1392_vm11, %v1390_v38 }
 0x4ef   : > { %v1513_v7 = vpop.permute.xlu0 %1512 }
 0x4f0   : > { %1516 = vst.msk [vmem:[#allocation4] sm:$0xf] %vm1515_vm12, %v1513_v7 }
 0x520   : > { %v2004_v2 = vpop.permute.xlu0 %2003 }
 0x521   : > { %2006 = vst.msk [vmem:[#allocation4 + $0x4] sm:$0xf] %vm1023_vm8, %v2004_v2 }
 0x524   : > { %v1636_v4 = vpop.permute.xlu0 %1635 }
 0x525   : > { %1639 = vst.msk [vmem:[#allocation4] sm:$0xf] %vm1638_vm13, %v1636_v4 }
 0x528   : > { %v1759_v6 = vpop.permute.xlu0 %1758  ;;  %v2126_v9 = vpop.permute.xlu1 %2125 }
 0x529   : > { %1762 = vst.msk [vmem:[#allocation4] sm:$0xf] %vm1761_vm14, %v1759_v6 }
 0x52a   : > { %2128 = vst.msk [vmem:[#allocation4 + $0x4] sm:$0xf] %vm1146_vm9, %v2126_v9 }
 0x530   : > { %v2248_v16 = vpop.permute.xlu1 %2247 }
 0x531   : > { %2250 = vst.msk [vmem:[#allocation4 + $0x4] sm:$0xf] %vm1269_vm10, %v2248_v16 }
 0x538   : > { %v2370_v37 = vpop.permute.xlu1 %2369 }
 0x539   : > { %2372 = vst.msk [vmem:[#allocation4 + $0x4] sm:$0xf] %vm1392_vm11, %v2370_v37 }
 0x540   : > { %v2492_v1 = vpop.permute.xlu1 %2491 }
 0x541   : > { %2494 = vst.msk [vmem:[#allocation4 + $0x4] sm:$0xf] %vm1515_vm12, %v2492_v1 }
 0x548   : > { %v2614_v41 = vpop.permute.xlu1 %2613 }
 0x549   : > { %2616 = vst.msk [vmem:[#allocation4 + $0x4] sm:$0xf] %vm1638_vm13, %v2614_v41 }
 0x550   : > { %v2736_v27 = vpop.permute.xlu1 %2735 }
 0x551   : > { %2738 = vst.msk [vmem:[#allocation4 + $0x4] sm:$0xf] %vm1761_vm14, %v2736_v27 }
 0x558   : > { %v3845_v42 = vld [vmem:[#allocation4] sm:$0xff]  }
 0x559   : > { %3730 = vmatmul.mubr.msk.bf16.vlgmr.msra.gmra.mxu1 %vm721_vm2, %v3845_v42 }
 0x55a   : > { %3757 = vmatprep.mubr.msk.bf16.mxu1 %vm3987_vm1, %v3986_v3  ;;  %3742 = vmatpush3.bf16.msra.mxu1 %v3848_v58  ;;  %v3417_v58 = vld [vmem:[%s4834_s27] ss:$0 sm:$0xff] }
 0x55b   : > { %3743 = vmatprep.subr.bf16.mxu1 %v3986_v3 }
 0x55e   : > { %3744 = vmatpush3.bf16.msra.mxu1 %v3849_v19 }
 0x55f   : > { %3745 = vmatprep.subr.bf16.mxu1 %v3986_v3 }
 0x562   : > { %3746 = vmatpush3.bf16.msra.mxu1 %v3850_v26 }
 0x563   : > { %3747 = vmatprep.subr.bf16.mxu1 %v3986_v3 }
 0x566   : > { %3748 = vmatpush3.bf16.msra.mxu1 %v3851_v60 }
 0x567   : > { %3749 = vmatprep.subr.bf16.mxu1 %v3986_v3 }
 0x56a   : > { %3750 = vmatpush3.bf16.msra.mxu1 %v3852_v13 }
 0x56b   : > { %3751 = vmatprep.subr.bf16.mxu1 %v3986_v3 }
 0x56e   : > { %3752 = vmatpush3.bf16.msra.mxu1 %v3853_v61 }
 0x56f   : > { %3753 = vmatprep.subr.bf16.mxu1 %v3986_v3 }
 0x572   : > { %3754 = vmatpush3.bf16.msra.mxu1 %v3854_v36 }
 0x573   : > { %3755 = vmatprep.subr.bf16.mxu1 %v3986_v3 }
 0x576   : > { %3756 = vmatpush3.bf16.msra.mxu1 %v3855_v39 }
 0x619   : > { %v2806_v46 = vpop.f32.mrf.mxu1 }
 0x61a   : > { %v2807_v59 = vadd.f32 %v3396_v43, %v2806_v46 }
 0x61b   : > { %v3731_v28 = vpop.f32.mrf.mxu1 }
 0x61c   : > { %v2813_v30 = vadd.f32 %v3932_v29, %v2807_v59 }
 0x61d   : > { %v2809_v31 = vpop.f32.mrf.mxu1 }
 0x61e   : > { %v2810_v33 = vadd.f32 %v3396_v43, %v2809_v31  ;;  %v2817_v62 = vsel %vm721_vm2, %v2813_v30, 0.0 }
 0x61f   : > { %2818 = vadd.xlane.f32.xlu0 %v2817_v62  ;;  %v3732_v18 = vpop.f32.mrf.mxu1 }
 0x620   : > { %v2814_v32 = vadd.f32 %v3933_v49, %v2810_v33 }
 0x622   : > { %v2820_v35 = vsel %vm721_vm2, %v2814_v32, 0.0 }
 0x623   : > { %2821 = vadd.xlane.f32.xlu1 %v2820_v35  ;;  %v3407_v35 = vld [vmem:[%s4832_s22] ss:$0 sm:$0xff] }
 0x6a8   : > { %v2819_v40 = vpop.xlane.xlu0 %2818 }
 0x6a9   : > { %v2824_v14 = vmul.f32 0.03125, %v2819_v40 }
 0x6ab   : > { %v2826_v0 = vsub.f32 %v2813_v30, %v2824_v14 }
 0x6ac   : > { %v2822_v34 = vpop.xlane.xlu1 %2821 }
 0x6ad   : > { %v2825_v47 = vmul.f32 0.03125, %v2822_v34  ;;  %v2828_v24 = vmul.f32 %v2826_v0, %v2826_v0 }
 0x6af   : > { %v2827_v48 = vsub.f32 %v2814_v32, %v2825_v47  ;;  %v2830_v8 = vsel %vm721_vm2, %v2828_v24, 0.0 }
 0x6b0   : > { %2831 = vadd.xlane.f32.xlu0 %v2830_v8 }
 0x6b1   : > { %v2829_v22 = vmul.f32 %v2827_v48, %v2827_v48 }
 0x6b3   : > { %v2833_v23 = vsel %vm721_vm2, %v2829_v22, 0.0 }
 0x6b4   : > { %2834 = vadd.xlane.f32.xlu0 %v2833_v23 }
 0x739   : > { %v2832_v51 = vpop.xlane.xlu0 %2831 }
 0x73a   : > { %v2836_v21 = vmul.f32 0.03125, %v2832_v51 }
 0x73c   : > { %v2838_v25 = vadd.f32 1e-05, %v2836_v21 }
 0x73d   : > { %v2835_v10 = vpop.xlane.xlu0 %2834 }
 0x73e   : > { %3920 = vrsqrt.f32 %v2838_v25  ;;  %v2837_v5 = vmul.f32 0.03125, %v2835_v10 }
 0x740   : > { %v2839_v52 = vadd.f32 1e-05, %v2837_v5 }
 0x742   : > { %3922 = vrsqrt.f32 %v2839_v52 }
 0x74b   : > { %v3921_v45 = vpop.eup %3920 }
 0x74c   : > { %v2842_v17 = vmul.f32 %v3921_v45, %v2826_v0 }
 0x74e   : > { %v2850_v55 = vmul.f32 %v3401_v53, %v2842_v17 }
 0x74f   : > { %v3923_v54 = vpop.eup %3922 }
 0x750   : > { %v2843_v11 = vmul.f32 %v3923_v54, %v2827_v48  ;;  %v2858_v57 = vadd.f32 %v3402_v15, %v2850_v55 }
 0x752   : > { %v2851_v56 = vmul.f32 %v3401_v53, %v2843_v11 }
 0x754   : > { %v4720_v20 = vadd.f32 %v3402_v15, %v2851_v56 }
 0x756   : > { %v2860_v12 = vpack.c.bf16 %v4720_v20, %v2858_v57 }
 0x758   : > { %3738 = vmatmul.mubr.msk.bf16.vlgmr.msra.gmra.mxu0 %vm721_vm2, %v2860_v12 }
 0x818   : > { %v2921_v38 = vpop.f32.mrf.mxu0 }
 0x819   : > { %v2922_v7 = vadd.f32 %v3403_v63, %v2921_v38 }
 0x81a   : > { %v3739_v2 = vpop.f32.mrf.mxu0 }
 0x81b   : > { %v2930_v4 = vmul.f32 0.044715, %v2922_v7  ;;  %v2928_v31 = vmul.f32 0.5, %v2922_v7 }
 0x81c   : > { %v2924_v6 = vpop.f32.mrf.mxu0 }
 0x81d   : > { %v2932_v9 = vmul.f32 %v2930_v4, %v2922_v7  ;;  %v2925_v16 = vadd.f32 %v3403_v63, %v2924_v6 }
 0x81e   : > { %v3740_v37 = vpop.f32.mrf.mxu0 }
 0x81f   : > { %v2934_v1 = vmul.f32 %v2932_v9, %v2922_v7  ;;  %v2931_v41 = vmul.f32 0.044715, %v2925_v16  ;;  %v2929_v33 = vmul.f32 0.5, %v2925_v16 }
 0x821   : > { %v2936_v27 = vadd.f32 %v2934_v1, %v2922_v7  ;;  %v2933_v42 = vmul.f32 %v2931_v41, %v2925_v16 }
 0x823   : > { %v2938_v43 = vmul.f32 0.7978846, %v2936_v27  ;;  %v2935_v3 = vmul.f32 %v2933_v42, %v2925_v16 }
 0x825   : > { %3924 = vtanh.f32 %v2938_v43  ;;  %v2937_v46 = vadd.f32 %v2935_v3, %v2925_v16 }
 0x827   : > { %v2939_v59 = vmul.f32 0.7978846, %v2937_v46 }
 0x829   : > { %3926 = vtanh.f32 %v2939_v59 }
 0x832   : > { %v3925_v28 = vpop.eup %3924 }
 0x833   : > { %v2942_v29 = vadd.f32 1.0, %v3925_v28 }
 0x835   : > { %v2944_v18 = vmul.f32 %v2942_v29, %v2928_v31 }
 0x836   : > { %v3927_v30 = vpop.eup %3926 }
 0x837   : > { %v2943_v62 = vadd.f32 1.0, %v3927_v30 }
 0x839   : > { %v2945_v49 = vmul.f32 %v2943_v62, %v2929_v33 }
 0x83b   : > { %v2946_v32 = vpack.c.bf16 %v2945_v49, %v2944_v18 }
 0x83d   : > { %3758 = vmatmul.mubr.bf16.vlgmr.msra.gmra.mxu1 %v2946_v32 }
 0x8fd   : > { %v3052_v40 = vpop.f32.mrf.mxu1 }
 0x8fe   : > { %v3053_v14 = vadd.f32 %v3407_v35, %v3052_v40 }
 0x8ff   : > { %v3759_v0 = vpop.f32.mrf.mxu1 }
 0x900   : > { %v3059_v34 = vadd.f32 %v3053_v14, %v2858_v57 }
 0x901   : > { %v3055_v47 = vpop.f32.mrf.mxu1 }
 0x902   : > { %v3056_v24 = vadd.f32 %v3407_v35, %v3055_v47  ;;  %v3063_v48 = vsel %vm721_vm2, %v3059_v34, 0.0 }
 0x903   : > { %3064 = vadd.xlane.f32.xlu1 %v3063_v48  ;;  %v3760_v8 = vpop.f32.mrf.mxu1 }
 0x904   : > { %v3060_v22 = vadd.f32 %v3056_v24, %v4720_v20  ;;  %v3416_v20 = vld [vmem:[%s4833_s19] ss:$0 sm:$0xff] }
 0x906   : > { %v3066_v23 = vsel %vm721_vm2, %v3060_v22, 0.0 }
 0x907   : > { %3067 = vadd.xlane.f32.xlu0 %v3066_v23 }
 0x98c   : > { %v3065_v50 = vpop.xlane.xlu1 %3064 }
 0x98d   : > { %v3069_v44 = vmul.f32 0.03125, %v3065_v50 }
 0x98f   : > { %v3071_v51 = vsub.f32 %v3059_v34, %v3069_v44 }
 0x990   : > { %v3068_v21 = vpop.xlane.xlu0 %3067 }
 0x991   : > { %v3070_v25 = vmul.f32 0.03125, %v3068_v21  ;;  %v3073_v10 = vmul.f32 %v3071_v51, %v3071_v51 }
 0x993   : > { %v3072_v5 = vsub.f32 %v3060_v22, %v3070_v25  ;;  %v3075_v52 = vsel %vm721_vm2, %v3073_v10, 0.0 }
 0x994   : > { %3076 = vadd.xlane.f32.xlu1 %v3075_v52 }
 0x995   : > { %v3074_v45 = vmul.f32 %v3072_v5, %v3072_v5 }
 0x997   : > { %v3078_v17 = vsel %vm721_vm2, %v3074_v45, 0.0 }
 0x998   : > { %3079 = vadd.xlane.f32.xlu0 %v3078_v17 }
 0xa1d   : > { %v3077_v53 = vpop.xlane.xlu1 %3076 }
 0xa1e   : > { %v3081_v54 = vmul.f32 0.03125, %v3077_v53 }
 0xa20   : > { %v3083_v11 = vadd.f32 1e-05, %v3081_v54 }
 0xa21   : > { %v3080_v55 = vpop.xlane.xlu0 %3079 }
 0xa22   : > { %3928 = vrsqrt.f32 %v3083_v11  ;;  %v3082_v15 = vmul.f32 0.03125, %v3080_v55 }
 0xa24   : > { %v3084_v56 = vadd.f32 1e-05, %v3082_v15 }
 0xa26   : > { %3930 = vrsqrt.f32 %v3084_v56 }
 0xa2f   : > { %v3929_v57 = vpop.eup %3928 }
 0xa30   : > { %v3087_v12 = vmul.f32 %v3929_v57, %v3071_v51 }
 0xa32   : > { %v3095_v19 = vmul.f32 %v3416_v20, %v3087_v12 }
 0xa33   : > { %v3931_v26 = vpop.eup %3930 }
 0xa34   : > { %v3103_v60 = vadd.f32 %v3417_v58, %v3095_v19  ;;  %v3088_v13 = vmul.f32 %v3931_v26, %v3072_v5 }
 0xa36   : > { %3105 = vst.msk [vmem:[#allocation2] sm:$0xff] %vm721_vm2, %v3103_v60  ;;  %v3096_v61 = vmul.f32 %v3416_v20, %v3088_v13  ;;  %3110 = sbr.rel (%p3418_p6) target bundleno = 2620 (0xa3c), region = 84 }
 0xa38   : > { %v3104_v36 = vadd.f32 %v3417_v58, %v3096_v61 }
 0xa3a   : > { %3106 = vst.msk [vmem:[#allocation2 + $0x8] sm:$0xff] %vm721_vm2, %v3104_v36 }
 0xa3b   : > { %3111 = vst.msk [vmem:[#allocation5] sm:$0xff] %vm721_vm2, %v3103_v60  ;;  %3112 = vst.msk [vmem:[#allocation5 + $0x8] sm:$0xff] %vm721_vm2, %v3104_v36 }
 0xa3c PF: > { %s4835_s18 = sld [smem:[#allocation9_spill]]  ;;  %s4018_s17 = smov [#allocation5]  }
 0xa3d   : > { %s3122_s25 = sshll.u32 %s4018_s17, 4  ;;  %s3123_s25 = int_to_ptr.vmem [resolvable:$true] %s3122_s25 }
 0xa3e   : > { %s3934_s21 = scalar_lea.vmem %s3123_s25, 256  ;;  %p3941_p11 = scmp.lt.s32.totalorder %s3123_s25, %s3123_s25 }
 0xa3f   : > { %p3935_p8 = scmp.ne.s32.totalorder %s3123_s25, %s3934_s21  ;;  %p3942_p12 = scmp.lt.s32.totalorder %s3934_s21, %s3934_s21 }
 0xa41   : > { %p3943_p13 = por %p3942_p12, %p3941_p11 }
 0xa42   : > { %s4836_s24 = sadd.s32 4294967295, %s4835_s18  }
 0xa43   : > { %p4771_p7 = scmp.eq.s32.totalorder %s4836_s24, 1 }
 0xa45   : > { %p3936_p9 = pnand %p3935_p8, %p4771_p7 }
 0xa47   : > { %p3937_p10 = pneg %p3936_p9 }
 0xa49   : > { %p3944_p0 = pnand %p3943_p13, %p3937_p10 }
 0xa4b   : > { %3947 = shalt.err (!%p3944_p0)
}
 0xa4c   : > { %s4019_s29 = smov 128   ;;  %s4838_s30 = sld [smem:[#allocation15_spill]] }
 0xa52   : > { %3762 = dma.vmem_to_hbm [thread:$0]  (%p4771_p7), %s3123_s25, 256, %s4838_s30, [#allocation6], %s4019_s29, %s4019_s29, %s4012_s14  }
 0xa53   : > { %3971 = dma.done.wait (%p4771_p7), [#allocation6], 256  }
 0xa54   : > { %3973 = vsyncadd (%p4771_p7), [#allocation6], 4294967040 }
 0xa55 PF: > { %s4839_s2 = sld [smem:[#allocation9_spill]] }
 0xa56   : > { %s4840_s29 = sld [smem:[#allocation8_spill]] }
 0xa57   : > { %s4841_s30 = sld [smem:[#allocation10_spill]] }
 0xa5b   : > { %s25_s15 = sadd.s32 1, %s4839_s2  }
 0xa5c   : > { %p22_p1 = scmp.ge.s32.totalorder %s25_s15, 4  }
 0xa5e   :  { %24 = sbr.rel (!%p22_p1) target bundleno = 8 (0x8), region = 152 }
 0xa63   :  { %3138 = vsyncpa [#allocation6], 1 }
 0xa64   :  { %3140 = vsyncpa [#allocation6 + $0x1], 1 }

</bundles_post_ra>
